<compile_context>
chip_gen: v7x
topology: tpu7x:2x2x1
jax: 0.10.0
libtpu: 0.0.40
codegen_flags: <defaults>
</compile_context>

<pallas_src>
import functools
import math

import jax
import jax.numpy as jnp
from jax import lax
from jax.experimental import pallas as pl
from jax.experimental.pallas import tpu as pltpu


@functools.lru_cache(maxsize=None)
def _vmem_limit_bytes():
    """Generation-aware VMEM budget: capacity - 16MiB, clamped to [32, 96] MiB."""
    cap = 64 * 1024 * 1024            # safe fallback (v7x-sized)
    try:
        info = pltpu.get_tpu_info()
        cap = int(getattr(info, "vmem_capacity_bytes", cap))
    except Exception:
        pass
    return int(min(max(cap - (16 << 20), 32 << 20), 96 << 20))


def _pick_tile(n, target, *, even=False, multiple=1):
    """Largest divisor of n <= target (even / multiple-of-k if requested);
    falls back to the smallest acceptable divisor, then to n itself."""
    target = max(1, min(n, int(target)))
    cands = [t for t in range(1, n + 1)
             if n % t == 0 and (not even or t % 2 == 0)
             and (t % multiple == 0 or t == n)]
    le = [t for t in cands if t <= target]
    if le:
        return max(le)
    return min(cands) if cands else n


def _tap_groups(K, cin):
    """Group conv taps so each group is one MXU matmul (im2col).  Full im2col
    for small Cin, per-kh row folding for medium Cin, per-tap for large Cin."""
    taps = [(kh, kw) for kh in range(K) for kw in range(K)]
    if K * K * cin <= 384:
        return [taps]
    if K * cin <= 512:
        return [taps[kh * K:(kh + 1) * K] for kh in range(K)]
    return [[t] for t in taps]


# ----------------------------------------------------------------------------
# Fused conv block kernel:
#   Conv2d(stride=1, 'same') over the channel-concat of `inputs`
#   + bias [+ ReLU] [+ BN eval-affine] [+ tanh] [+ fused MaxPool2d(2,2)]
# ----------------------------------------------------------------------------
def pallas_conv_block(inputs, weights, bst, *, relu=True, tanh=False,
                      use_affine=True, pool=False, tile_h=None,
                      out_dtype=jnp.bfloat16):
    """inputs:  list of NHWC bf16 tensors sharing (B, H, W).
       weights: list of (K*K, Cin_i, Cout) bf16, split to match `inputs`
                (the channel concat is never materialized).
       bst:     (3, Cout) f32 = [bias; bn_scale; bn_shift].
       Returns the full-resolution output; additionally the 2x2-maxpooled
       output when pool=True."""
    B, H, W, _ = inputs[0].shape
    KK, _, Cout = weights[0].shape
    K = int(round(math.sqrt(KK)))
    pad = K // 2
    Wp = W + 2 * pad

    n_in = len(inputs)
    cins = [int(x.shape[-1]) for x in inputs]
    groups = [_tap_groups(K, c) for c in cins]
    max_patch = max(len(g[0]) * c for g, c in zip(groups, cins))

    # Adaptive H tile so (bf16 in/out blocks x2 buffers + f32 accumulator +
    # im2col patch) fit the generation's VMEM budget.
    budget = _vmem_limit_bytes()
    if tile_h is None:
        per_row = (4 * sum(cins) * Wp          # bf16 inputs, double buffered
                   + 4 * Cout * W              # bf16 full output, double buffered
                   + (2 * Cout * W if pool else 0)
                   + 4 * Cout * W              # f32 accumulator
                   + 2 * max_patch * W)        # bf16 im2col patch
        tile_h = max(2, (budget // 2) // max(per_row, 1))
    TH = _pick_tile(H, min(int(tile_h), 256), even=pool)
    if pool:
        assert H % 2 == 0 and W % 2 == 0 and TH % 2 == 0
    n_t = H // TH
    G = B * n_t

    # Halo-duplicated H tiles: (B*n_t, TH + 2*pad, W + 2*pad, Cin_i), bf16.
    # TODO(synk): replace with an in-kernel halo DMA to drop this HBM copy.
    tiled = []
    for x in inputs:
        xp = jnp.pad(x.astype(jnp.bfloat16),
                     ((0, 0), (pad, pad), (pad, pad), (0, 0)))
        if n_t == 1:
            tiled.append(xp)
        else:
            tt = jnp.stack(
                [xp[:, i * TH:i * TH + TH + 2 * pad] for i in range(n_t)], axis=1)
            tiled.append(tt.reshape(G, TH + 2 * pad, Wp, x.shape[-1]))

    # Weights as (K*K*Cin_i, Cout), tap-major rows, matching the im2col layout.
    w2d = [w.astype(jnp.bfloat16).reshape(KK * c, Cout)
           for w, c in zip(weights, cins)]

    def kernel(*refs):
        x_refs = refs[:n_in]
        w_refs = refs[n_in:2 * n_in]
        bst_ref = refs[2 * n_in]
        out_refs = refs[2 * n_in + 1:]

        acc = None
        for x_ref, w_ref, cin, grp in zip(x_refs, w_refs, cins, groups):
            xv = x_ref[0]                               # (TH+2p, Wp, Cin) bf16
            row0 = 0
            for g in grp:
                if len(g) == 1:
                    kh, kw = g[0]
                    patch = xv[kh:kh + TH, kw:kw + W, :].reshape(TH * W, cin)
                else:
                    patch = jnp.concatenate(
                        [xv[kh:kh + TH, kw:kw + W, :].reshape(TH * W, cin)
                         for kh, kw in g], axis=1)      # (TH*W, len(g)*cin)
                rows = len(g) * cin
                part = jnp.dot(patch, w_ref[row0:row0 + rows, :],
                               preferred_element_type=jnp.float32)
                acc = part if acc is None else acc + part
                row0 += rows

        y = acc + bst_ref[0:1, :]
        if relu:
            y = jnp.maximum(y, 0.0)
        if use_affine:
            y = y * bst_ref[1:2, :] + bst_ref[2:3, :]
        if tanh:
            y = jnp.tanh(y)
        y = y.reshape(TH, W, Cout)
        out_refs[0][0] = y.astype(out_refs[0].dtype)
        if pool:
            p = jnp.max(y.reshape(TH // 2, 2, W, Cout), axis=1)
            p = jnp.max(p.reshape(TH // 2, W // 2, 2, Cout), axis=2)
            out_refs[1][0] = p.astype(out_refs[1].dtype)

    in_specs = (
        [pl.BlockSpec((1, TH + 2 * pad, Wp, c), lambda i: (i, 0, 0, 0))
         for c in cins]
        + [pl.BlockSpec((KK * c, Cout), lambda i: (0, 0)) for c in cins]
        + [pl.BlockSpec((3, Cout), lambda i: (0, 0))]
    )
    out_shapes = [jax.ShapeDtypeStruct((G, TH, W, Cout), out_dtype)]
    out_specs = [pl.BlockSpec((1, TH, W, Cout), lambda i: (i, 0, 0, 0))]
    if pool:
        out_shapes.append(
            jax.ShapeDtypeStruct((G, TH // 2, W // 2, Cout), out_dtype))
        out_specs.append(
            pl.BlockSpec((1, TH // 2, W // 2, Cout), lambda i: (i, 0, 0, 0)))

    cin_total = sum(cins)
    out_bytes = jnp.dtype(out_dtype).itemsize
    cost = pl.CostEstimate(
        flops=2 * B * H * W * K * K * cin_total * Cout,
        transcendentals=(B * H * W * Cout if tanh else 0),
        bytes_accessed=(2 * B * H * W * cin_total
                        + 2 * KK * cin_total * Cout
                        + out_bytes * B * H * W * Cout * (2 if pool else 1)),
    )

    outs = pl.pallas_call(
        kernel,
        out_shape=tuple(out_shapes),
        grid=(G,),
        in_specs=in_specs,
        out_specs=tuple(out_specs),
        compiler_params=pltpu.CompilerParams(
            dimension_semantics=("parallel",),
            vmem_limit_bytes=budget),
        cost_estimate=cost,
    )(*tiled, *w2d, bst)

    full = outs[0].reshape(B, H, W, Cout)
    if pool:
        return full, outs[1].reshape(B, H // 2, W // 2, Cout)
    return full


# ----------------------------------------------------------------------------
# Bilinear 2x upsample (align_corners=True): two separable interp matmul
# kernels, no wrapper transposes, no (Win*C, Wout*C) kron matrix.
# ----------------------------------------------------------------------------
def _interp_matrix(n_out, n_in):
    """Linear interpolation matrix (align_corners=True), shape (n_out, n_in)."""
    if n_in == 1:
        return jnp.ones((n_out, 1), jnp.float32)
    idx = jnp.arange(n_out, dtype=jnp.float32)
    src = idx * (n_in - 1) / (n_out - 1)
    lo = jnp.clip(jnp.floor(src).astype(jnp.int32), 0, n_in - 2)
    frac = src - lo.astype(jnp.float32)
    rows = jnp.arange(n_out)
    A = jnp.zeros((n_out, n_in), jnp.float32)
    A = A.at[rows, lo].add(1.0 - frac)
    A = A.at[rows, lo + 1].add(frac)
    return A


def _pallas_interp_h(x, A):
    """y[b,o,w,c] = sum_h A[o,h] x[b,h,w,c]   (full-H blocks, tiled over W)."""
    B, H, W, C = x.shape
    Hout = A.shape[0]
    tw = max(1, (2 << 20) // max(1, (H + Hout) * C * 2))
    TW = _pick_tile(W, tw, multiple=8)
    n_t = W // TW

    def kernel(a_ref, x_ref, o_ref):
        xm = x_ref[0].reshape(H, TW * C)
        y = jnp.dot(a_ref[...], xm, preferred_element_type=jnp.float32)
        o_ref[0] = y.reshape(Hout, TW, C).astype(o_ref.dtype)

    cost = pl.CostEstimate(
        flops=2 * B * Hout * H * W * C, transcendentals=0,
        bytes_accessed=2 * B * W * C * (H + Hout) + 2 * Hout * H)
    return pl.pallas_call(
        kernel,
        out_shape=jax.ShapeDtypeStruct((B, Hout, W, C), jnp.bfloat16),
        grid=(B, n_t),
        in_specs=[pl.BlockSpec((Hout, H), lambda b, t: (0, 0)),
                  pl.BlockSpec((1, H, TW, C), lambda b, t: (b, 0, t, 0))],
        out_specs=pl.BlockSpec((1, Hout, TW, C), lambda b, t: (b, 0, t, 0)),
        compiler_params=pltpu.CompilerParams(
            dimension_semantics=("parallel", "parallel"),
            vmem_limit_bytes=_vmem_limit_bytes()),
        cost_estimate=cost,
    )(A, x)


def _pallas_interp_w(x, Bm):
    """y[b,h,p,c] = sum_w Bm[p,w] x[b,h,w,c]  (full-W blocks, tiled over H).
    Per-row (Wout, W) @ (W, C) matmuls -> no transposes needed anywhere."""
    B, H, W, C = x.shape
    Wout = Bm.shape[0]
    th = max(1, (2 << 20) // max(1, (W + Wout) * C * 2))
    TH = _pick_tile(H, min(th, 32))
    n_t = H // TH

    def kernel(b_ref, x_ref, o_ref):
        xv = x_ref[0]                                        # (TH, W, C)
        for r in range(TH):
            y = jnp.dot(b_ref[...], xv[r],
                        preferred_element_type=jnp.float32)  # (Wout, C)
            o_ref[0, r] = y.astype(o_ref.dtype)

    cost = pl.CostEstimate(
        flops=2 * B * H * Wout * W * C, transcendentals=0,
        bytes_accessed=2 * B * H * C * (W + Wout) + 2 * Wout * W)
    return pl.pallas_call(
        kernel,
        out_shape=jax.ShapeDtypeStruct((B, H, Wout, C), jnp.bfloat16),
        grid=(B, n_t),
        in_specs=[pl.BlockSpec((Wout, W), lambda b, t: (0, 0)),
                  pl.BlockSpec((1, TH, W, C), lambda b, t: (b, t, 0, 0))],
        out_specs=pl.BlockSpec((1, TH, Wout, C), lambda b, t: (b, t, 0, 0)),
        compiler_params=pltpu.CompilerParams(
            dimension_semantics=("parallel", "parallel"),
            vmem_limit_bytes=_vmem_limit_bytes()),
        cost_estimate=cost,
    )(Bm, x)


def pallas_upsample2x(x):
    """Upsample(scale=2, bilinear, align_corners=True) on NHWC (bf16 I/O)."""
    B, H, W, C = x.shape
    A = _interp_matrix(2 * H, H).astype(jnp.bfloat16)
    Bm = _interp_matrix(2 * W, W).astype(jnp.bfloat16)
    y = _pallas_interp_h(x.astype(jnp.bfloat16), A)   # (B, 2H, W, C)
    return _pallas_interp_w(y, Bm)                    # (B, 2H, 2W, C)


# ----------------------------------------------------------------------------
# Deterministic parameter init (shapes follow the PyTorch module __init__)
# ----------------------------------------------------------------------------
def _init_block(key, cin, cout, k, use_bn):
    k1, k2, k3, k4, k5, k6 = jax.random.split(key, 6)
    fan_in = cin * k * k
    w = (jax.random.normal(k1, (k * k, cin, cout), jnp.float32)
         / math.sqrt(fan_in)).astype(jnp.bfloat16)
    b = 0.01 * jax.random.normal(k2, (1, cout), jnp.float32)
    if use_bn:
        eps = 1e-5
        gamma = 1.0 + 0.1 * jax.random.normal(k3, (1, cout), jnp.float32)
        beta = 0.1 * jax.random.normal(k4, (1, cout), jnp.float32)
        mean = 0.1 * jax.random.normal(k5, (1, cout), jnp.float32)
        var = jnp.abs(1.0 + 0.1 * jax.random.normal(k6, (1, cout), jnp.float32))
        scale = gamma / jnp.sqrt(var + eps)
        shift = beta - mean * scale
    else:
        scale = jnp.ones((1, cout), jnp.float32)
        shift = jnp.zeros((1, cout), jnp.float32)
    bst = jnp.concatenate([b, scale, shift], axis=0)   # (3, cout): bias/scale/shift
    return (w, bst)


def init_params(key, n_feats):
    nf = n_feats
    cfg = {
        "conv1":   (3,       nf,     5, False),
        "conv2":   (nf,      2 * nf, 3, True),
        "conv3":   (2 * nf,  2 * nf, 3, True),
        "conv4":   (2 * nf,  4 * nf, 3, True),
        "conv5":   (4 * nf,  4 * nf, 3, True),
        "conv6":   (4 * nf,  8 * nf, 3, True),
        "deconv1": (8 * nf,  8 * nf, 3, True),
        "deconv2": (12 * nf, 8 * nf, 3, True),
        "deconv3": (10 * nf, 4 * nf, 3, True),
        "out1":    (5 * nf,  4 * nf, 3, True),
        "out2":    (4 * nf,  8 * nf, 3, True),
        "final":   (8 * nf,  3,      3, False),
    }
    params = {}
    keys = jax.random.split(key, len(cfg))
    for kk, (name, (cin, cout, ksz, use_bn)) in zip(keys, cfg.items()):
        params[name] = _init_block(kk, cin, cout, ksz, use_bn)
    return params


# ----------------------------------------------------------------------------
# Forward pass (mirrors FUnIEGeneratorV2.forward)
# ----------------------------------------------------------------------------
def funie_forward(x_nchw, params, *, tile_h=None):
    x = jnp.transpose(x_nchw, (0, 2, 3, 1)).astype(jnp.bfloat16)   # NCHW -> NHWC

    def conv_single(xin, p, **kw):
        w, bst = p
        return pallas_conv_block([xin], [w], bst, tile_h=tile_h, **kw)

    def conv_pair(xa, xb, p, **kw):
        # conv over cat([xa, xb], channel) without materializing the concat.
        w, bst = p
        ca = xa.shape[-1]
        return pallas_conv_block([xa, xb], [w[:, :ca], w[:, ca:]], bst,
                                 tile_h=tile_h, **kw)

    # Encoder (pools fused into conv1/conv3/conv5 epilogues)
    d1, d1a = conv_single(x, params["conv1"], pool=True, use_affine=False)
    d2 = conv_single(d1a, params["conv2"])
    d3, d3a = conv_single(d2, params["conv3"], pool=True)
    d4 = conv_single(d3a, params["conv4"])
    d5, d5a = conv_single(d4, params["conv5"], pool=True)
    d6 = conv_single(d5a, params["conv6"])

    # Decoder: deconvN = Upsample2x -> Conv3x3 -> ReLU -> BN.
    # cat(a, b) inputs are handled by upsampling each part and splitting the
    # conv weight along Cin (concat never materialized; order matches torch.cat).
    dc1 = conv_single(pallas_upsample2x(d6), params["deconv1"])
    dc2 = conv_pair(pallas_upsample2x(dc1), pallas_upsample2x(d5),
                    params["deconv2"])
    dc3 = conv_pair(pallas_upsample2x(dc2), pallas_upsample2x(d3),
                    params["deconv3"])

    y = conv_pair(dc3, d1, params["out1"])
    y = conv_single(y, params["out2"])
    y = conv_single(y, params["final"], relu=False, tanh=True,
                    use_affine=False, out_dtype=jnp.float32)

    return jnp.transpose(y, (0, 3, 1, 2))                    # back to NCHW


# ----------------------------------------------------------------------------
if __name__ == "__main__":
    n_feats = 8          # small, structurally identical to the module (default 32)
    B, H, W = 2, 16, 16  # spatial must be divisible by 8 (three 2x pools)

    key = jax.random.PRNGKey(0)
    k_x, k_p = jax.random.split(key)
    x = jax.random.normal(k_x, (B, 3, H, W), jnp.float32)    # NCHW, like PyTorch
    params = init_params(k_p, n_feats)

    # --- unit check: fused conv (im2col + halo tiling + weight split + pool)
    kc1, kc2, kc3 = jax.random.split(jax.random.PRNGKey(1), 3)
    tw, tbst = _init_block(kc1, 6, 16, 3, True)
    xt = jax.random.normal(kc2, (2, 16, 16, 6), jnp.float32).astype(jnp.bfloat16)
    full, pooled = pallas_conv_block(
        [xt[..., :2], xt[..., 2:]], [tw[:, :2], tw[:, 2:]], tbst,
        pool=True, tile_h=8)
    ref = lax.conv_general_dilated(
        xt, tw.reshape(3, 3, 6, 16), (1, 1), "SAME",
        dimension_numbers=("NHWC", "HWIO", "NHWC"),
        preferred_element_type=jnp.float32)
    ref = jnp.maximum(ref + tbst[0].reshape(1, 1, 1, -1), 0.0)
    ref = ref * tbst[1].reshape(1, 1, 1, -1) + tbst[2].reshape(1, 1, 1, -1)
    ref_pool = ref.reshape(2, 8, 2, 8, 2, 16).max(axis=(2, 4))
    assert bool(jnp.allclose(full.astype(jnp.float32), ref,
                             rtol=2e-2, atol=2e-2))
    assert bool(jnp.allclose(pooled.astype(jnp.float32), ref_pool,
                             rtol=2e-2, atol=2e-2))

    # --- unit check: separable bilinear 2x upsample vs direct einsum reference
    xu = jax.random.normal(kc3, (2, 4, 6, 16), jnp.float32).astype(jnp.bfloat16)
    up = pallas_upsample2x(xu)
    ref_up = jnp.einsum("Hh,Ww,bhwc->bHWc",
                        _interp_matrix(8, 4), _interp_matrix(12, 6),
                        xu.astype(jnp.float32))
    assert bool(jnp.allclose(up.astype(jnp.float32), ref_up,
                             rtol=2e-2, atol=2e-2))

    # --- full forward pass (tile_h=8 so the halo-tiled path is exercised here)
    fwd = jax.jit(functools.partial(funie_forward, params=params, tile_h=8))
    out = jax.block_until_ready(fwd(x))

    assert out.shape == (B, 3, H, W), out.shape
    assert bool(jnp.all(jnp.isfinite(out)))
    assert bool(jnp.all(jnp.abs(out) <= 1.0 + 1e-6))   # tanh output range
    print("KERNEL_OK")
</pallas_src>

<mosaic_0001>
module attributes {stable_mosaic.version = 11 : i64} {
  func.func @kernel(%arg0: i32, %arg1: memref<1x10x18x2xbf16, #tpu.memory_space<vmem>>, %arg2: memref<1x10x18x4xbf16, #tpu.memory_space<vmem>>, %arg3: memref<18x16xbf16, #tpu.memory_space<vmem>>, %arg4: memref<36x16xbf16, #tpu.memory_space<vmem>>, %arg5: memref<3x16xf32, #tpu.memory_space<vmem>>, %arg6: memref<1x8x16x16xbf16, #tpu.memory_space<vmem>>, %arg7: memref<1x4x8x16xbf16, #tpu.memory_space<vmem>>) attributes {dimension_semantics = [#tpu.dimension_semantics<parallel>], iteration_bounds = array<i64: 4>, scalar_prefetch = 0 : i64, scratch_operands = 0 : i64, tpu.core_type = #tpu.core_type<tc>, window_params = [{transform_indices = @transform_0, window_bounds = array<i64: 1, 10, 18, 2>}, {transform_indices = @transform_1, window_bounds = array<i64: 1, 10, 18, 4>}, {pipeline_mode = #tpu.pipeline_mode<synchronous>, transform_indices = @transform_2, window_bounds = array<i64: 18, 16>}, {pipeline_mode = #tpu.pipeline_mode<synchronous>, transform_indices = @transform_3, window_bounds = array<i64: 36, 16>}, {pipeline_mode = #tpu.pipeline_mode<synchronous>, transform_indices = @transform_4, window_bounds = array<i64: 3, 16>}, {transform_indices = @transform_5, window_bounds = array<i64: 1, 8, 16, 16>}, {transform_indices = @transform_6, window_bounds = array<i64: 1, 4, 8, 16>}]} {
    %c0 = arith.constant 0 : index
    %c0_0 = arith.constant 0 : index
    %c0_1 = arith.constant 0 : index
    %c0_2 = arith.constant 0 : index
    %0 = vector.load %arg1[%c0, %c0_0, %c0_1, %c0_2] : memref<1x10x18x2xbf16, #tpu.memory_space<vmem>>, vector<1x10x18x2xbf16>
    %1 = vector.shape_cast %0 : vector<1x10x18x2xbf16> to vector<10x18x2xbf16>
    %2 = vector.extract_strided_slice %1 {offsets = [0, 0, 0], sizes = [8, 16, 2], strides = [1, 1, 1]} : vector<10x18x2xbf16> to vector<8x16x2xbf16>
    %3 = vector.shape_cast %2 : vector<8x16x2xbf16> to vector<128x2xbf16>
    %4 = vector.extract_strided_slice %1 {offsets = [0, 1, 0], sizes = [8, 16, 2], strides = [1, 1, 1]} : vector<10x18x2xbf16> to vector<8x16x2xbf16>
    %5 = vector.shape_cast %4 : vector<8x16x2xbf16> to vector<128x2xbf16>
    %6 = vector.extract_strided_slice %1 {offsets = [0, 2, 0], sizes = [8, 16, 2], strides = [1, 1, 1]} : vector<10x18x2xbf16> to vector<8x16x2xbf16>
    %7 = vector.shape_cast %6 : vector<8x16x2xbf16> to vector<128x2xbf16>
    %8 = vector.extract_strided_slice %1 {offsets = [1, 0, 0], sizes = [8, 16, 2], strides = [1, 1, 1]} : vector<10x18x2xbf16> to vector<8x16x2xbf16>
    %9 = vector.shape_cast %8 : vector<8x16x2xbf16> to vector<128x2xbf16>
    %10 = vector.extract_strided_slice %1 {offsets = [1, 1, 0], sizes = [8, 16, 2], strides = [1, 1, 1]} : vector<10x18x2xbf16> to vector<8x16x2xbf16>
    %11 = vector.shape_cast %10 : vector<8x16x2xbf16> to vector<128x2xbf16>
    %12 = vector.extract_strided_slice %1 {offsets = [1, 2, 0], sizes = [8, 16, 2], strides = [1, 1, 1]} : vector<10x18x2xbf16> to vector<8x16x2xbf16>
    %13 = vector.shape_cast %12 : vector<8x16x2xbf16> to vector<128x2xbf16>
    %14 = vector.extract_strided_slice %1 {offsets = [2, 0, 0], sizes = [8, 16, 2], strides = [1, 1, 1]} : vector<10x18x2xbf16> to vector<8x16x2xbf16>
    %15 = vector.shape_cast %14 : vector<8x16x2xbf16> to vector<128x2xbf16>
    %16 = vector.extract_strided_slice %1 {offsets = [2, 1, 0], sizes = [8, 16, 2], strides = [1, 1, 1]} : vector<10x18x2xbf16> to vector<8x16x2xbf16>
    %17 = vector.shape_cast %16 : vector<8x16x2xbf16> to vector<128x2xbf16>
    %18 = vector.extract_strided_slice %1 {offsets = [2, 2, 0], sizes = [8, 16, 2], strides = [1, 1, 1]} : vector<10x18x2xbf16> to vector<8x16x2xbf16>
    %19 = vector.shape_cast %18 : vector<8x16x2xbf16> to vector<128x2xbf16>
    %20 = tpu.concatenate %3, %5, %7, %9, %11, %13, %15, %17, %19 in 1 : vector<128x2xbf16>, vector<128x2xbf16>, vector<128x2xbf16>, vector<128x2xbf16>, vector<128x2xbf16>, vector<128x2xbf16>, vector<128x2xbf16>, vector<128x2xbf16>, vector<128x2xbf16> -> vector<128x18xbf16>
    %c0_3 = arith.constant 0 : index
    %c0_4 = arith.constant 0 : index
    %21 = vector.load %arg3[%c0_3, %c0_4] : memref<18x16xbf16, #tpu.memory_space<vmem>>, vector<18x16xbf16>
    %cst = arith.constant dense<0.000000e+00> : vector<128x16xf32>
    %22 = tpu.matmul %20, %21, %cst {dimension_numbers = #tpu.dot_dimension_numbers<[1], [0], [0], [1], [0, 0, 1, 1], [], []>} : vector<128x18xbf16>, vector<18x16xbf16>, vector<128x16xf32> -> vector<128x16xf32>
    %c0_5 = arith.constant 0 : index
    %c0_6 = arith.constant 0 : index
    %c0_7 = arith.constant 0 : index
    %c0_8 = arith.constant 0 : index
    %23 = vector.load %arg2[%c0_5, %c0_6, %c0_7, %c0_8] : memref<1x10x18x4xbf16, #tpu.memory_space<vmem>>, vector<1x10x18x4xbf16>
    %24 = vector.shape_cast %23 : vector<1x10x18x4xbf16> to vector<10x18x4xbf16>
    %25 = vector.extract_strided_slice %24 {offsets = [0, 0, 0], sizes = [8, 16, 4], strides = [1, 1, 1]} : vector<10x18x4xbf16> to vector<8x16x4xbf16>
    %26 = vector.shape_cast %25 : vector<8x16x4xbf16> to vector<128x4xbf16>
    %27 = vector.extract_strided_slice %24 {offsets = [0, 1, 0], sizes = [8, 16, 4], strides = [1, 1, 1]} : vector<10x18x4xbf16> to vector<8x16x4xbf16>
    %28 = vector.shape_cast %27 : vector<8x16x4xbf16> to vector<128x4xbf16>
    %29 = vector.extract_strided_slice %24 {offsets = [0, 2, 0], sizes = [8, 16, 4], strides = [1, 1, 1]} : vector<10x18x4xbf16> to vector<8x16x4xbf16>
    %30 = vector.shape_cast %29 : vector<8x16x4xbf16> to vector<128x4xbf16>
    %31 = vector.extract_strided_slice %24 {offsets = [1, 0, 0], sizes = [8, 16, 4], strides = [1, 1, 1]} : vector<10x18x4xbf16> to vector<8x16x4xbf16>
    %32 = vector.shape_cast %31 : vector<8x16x4xbf16> to vector<128x4xbf16>
    %33 = vector.extract_strided_slice %24 {offsets = [1, 1, 0], sizes = [8, 16, 4], strides = [1, 1, 1]} : vector<10x18x4xbf16> to vector<8x16x4xbf16>
    %34 = vector.shape_cast %33 : vector<8x16x4xbf16> to vector<128x4xbf16>
    %35 = vector.extract_strided_slice %24 {offsets = [1, 2, 0], sizes = [8, 16, 4], strides = [1, 1, 1]} : vector<10x18x4xbf16> to vector<8x16x4xbf16>
    %36 = vector.shape_cast %35 : vector<8x16x4xbf16> to vector<128x4xbf16>
    %37 = vector.extract_strided_slice %24 {offsets = [2, 0, 0], sizes = [8, 16, 4], strides = [1, 1, 1]} : vector<10x18x4xbf16> to vector<8x16x4xbf16>
    %38 = vector.shape_cast %37 : vector<8x16x4xbf16> to vector<128x4xbf16>
    %39 = vector.extract_strided_slice %24 {offsets = [2, 1, 0], sizes = [8, 16, 4], strides = [1, 1, 1]} : vector<10x18x4xbf16> to vector<8x16x4xbf16>
    %40 = vector.shape_cast %39 : vector<8x16x4xbf16> to vector<128x4xbf16>
    %41 = vector.extract_strided_slice %24 {offsets = [2, 2, 0], sizes = [8, 16, 4], strides = [1, 1, 1]} : vector<10x18x4xbf16> to vector<8x16x4xbf16>
    %42 = vector.shape_cast %41 : vector<8x16x4xbf16> to vector<128x4xbf16>
    %43 = tpu.concatenate %26, %28, %30, %32, %34, %36, %38, %40, %42 in 1 : vector<128x4xbf16>, vector<128x4xbf16>, vector<128x4xbf16>, vector<128x4xbf16>, vector<128x4xbf16>, vector<128x4xbf16>, vector<128x4xbf16>, vector<128x4xbf16>, vector<128x4xbf16> -> vector<128x36xbf16>
    %c0_9 = arith.constant 0 : index
    %c0_10 = arith.constant 0 : index
    %44 = vector.load %arg4[%c0_9, %c0_10] : memref<36x16xbf16, #tpu.memory_space<vmem>>, vector<36x16xbf16>
    %cst_11 = arith.constant dense<0.000000e+00> : vector<128x16xf32>
    %45 = tpu.matmul %43, %44, %cst_11 {dimension_numbers = #tpu.dot_dimension_numbers<[1], [0], [0], [1], [0, 0, 1, 1], [], []>} : vector<128x36xbf16>, vector<36x16xbf16>, vector<128x16xf32> -> vector<128x16xf32>
    %46 = arith.addf %22, %45 : vector<128x16xf32>
    %c0_12 = arith.constant 0 : index
    %c0_13 = arith.constant 0 : index
    %47 = vector.load %arg5[%c0_12, %c0_13] : memref<3x16xf32, #tpu.memory_space<vmem>>, vector<1x16xf32>
    %48 = vector.broadcast %47 : vector<1x16xf32> to vector<128x16xf32>
    %49 = arith.addf %46, %48 : vector<128x16xf32>
    %cst_14 = arith.constant 0.000000e+00 : f32
    %50 = vector.broadcast %cst_14 : f32 to vector<128x16xf32>
    %51 = arith.maximumf %49, %50 : vector<128x16xf32>
    %c1 = arith.constant 1 : index
    %c0_15 = arith.constant 0 : index
    %52 = vector.load %arg5[%c1, %c0_15] : memref<3x16xf32, #tpu.memory_space<vmem>>, vector<1x16xf32>
    %53 = vector.broadcast %52 : vector<1x16xf32> to vector<128x16xf32>
    %54 = arith.mulf %51, %53 : vector<128x16xf32>
    %c2 = arith.constant 2 : index
    %c0_16 = arith.constant 0 : index
    %55 = vector.load %arg5[%c2, %c0_16] : memref<3x16xf32, #tpu.memory_space<vmem>>, vector<1x16xf32>
    %56 = vector.broadcast %55 : vector<1x16xf32> to vector<128x16xf32>
    %57 = arith.addf %54, %56 : vector<128x16xf32>
    %58 = vector.shape_cast %57 : vector<128x16xf32> to vector<8x16x16xf32>
    %59 = arith.truncf %58 : vector<8x16x16xf32> to vector<8x16x16xbf16>
    %c0_17 = arith.constant 0 : index
    %c0_18 = arith.constant 0 : index
    %c0_19 = arith.constant 0 : index
    %c0_20 = arith.constant 0 : index
    %60 = vector.load %arg6[%c0_17, %c0_18, %c0_19, %c0_20] : memref<1x8x16x16xbf16, #tpu.memory_space<vmem>>, vector<1x8x16x16xbf16>
    %61 = vector.shape_cast %60 : vector<1x8x16x16xbf16> to vector<8x16x16xbf16>
    %62 = vector.shape_cast %59 : vector<8x16x16xbf16> to vector<1x8x16x16xbf16>
    tpu.vector_store %arg6[%c0_17, %c0_18, %c0_19, %c0_20], %62 {strides = array<i32>} : memref<1x8x16x16xbf16, #tpu.memory_space<vmem>>, vector<1x8x16x16xbf16>,
    %63 = vector.shape_cast %58 : vector<8x16x16xf32> to vector<4x2x16x16xf32>
    %cst_21 = arith.constant dense<0xFF800000> : vector<4x16x16xf32>
    %64 = vector.multi_reduction <maximumf>, %63, %cst_21 [1] : vector<4x2x16x16xf32> to vector<4x16x16xf32>
    %65 = vector.shape_cast %64 : vector<4x16x16xf32> to vector<4x8x2x16xf32>
    %cst_22 = arith.constant dense<0xFF800000> : vector<4x8x16xf32>
    %66 = vector.multi_reduction <maximumf>, %65, %cst_22 [2] : vector<4x8x2x16xf32> to vector<4x8x16xf32>
    %67 = arith.truncf %66 : vector<4x8x16xf32> to vector<4x8x16xbf16>
    %c0_23 = arith.constant 0 : index
    %c0_24 = arith.constant 0 : index
    %c0_25 = arith.constant 0 : index
    %c0_26 = arith.constant 0 : index
    %68 = vector.load %arg7[%c0_23, %c0_24, %c0_25, %c0_26] : memref<1x4x8x16xbf16, #tpu.memory_space<vmem>>, vector<1x4x8x16xbf16>
    %69 = vector.shape_cast %68 : vector<1x4x8x16xbf16> to vector<4x8x16xbf16>
    %70 = vector.shape_cast %67 : vector<4x8x16xbf16> to vector<1x4x8x16xbf16>
    tpu.vector_store %arg7[%c0_23, %c0_24, %c0_25, %c0_26], %70 {strides = array<i32>} : memref<1x4x8x16xbf16, #tpu.memory_space<vmem>>, vector<1x4x8x16xbf16>,
    return
  }
  func.func @transform_0(%arg0: i32) -> (i32, i32, i32, i32) {
    %c0_i32 = arith.constant 0 : i32
    %c0_i32_0 = arith.constant 0 : i32
    %c0_i32_1 = arith.constant 0 : i32
    %c0_i32_2 = arith.constant 0 : i32
    return %arg0, %c0_i32, %c0_i32_0, %c0_i32_1 : i32, i32, i32, i32
  }
  func.func @transform_1(%arg0: i32) -> (i32, i32, i32, i32) {
    %c0_i32 = arith.constant 0 : i32
    %c0_i32_0 = arith.constant 0 : i32
    %c0_i32_1 = arith.constant 0 : i32
    %c0_i32_2 = arith.constant 0 : i32
    return %arg0, %c0_i32, %c0_i32_0, %c0_i32_1 : i32, i32, i32, i32
  }
  func.func @transform_2(%arg0: i32) -> (i32, i32) {
    %c0_i32 = arith.constant 0 : i32
    %c0_i32_0 = arith.constant 0 : i32
    %c0_i32_1 = arith.constant 0 : i32
    return %c0_i32, %c0_i32_0 : i32, i32
  }
  func.func @transform_3(%arg0: i32) -> (i32, i32) {
    %c0_i32 = arith.constant 0 : i32
    %c0_i32_0 = arith.constant 0 : i32
    %c0_i32_1 = arith.constant 0 : i32
    return %c0_i32, %c0_i32_0 : i32, i32
  }
  func.func @transform_4(%arg0: i32) -> (i32, i32) {
    %c0_i32 = arith.constant 0 : i32
    %c0_i32_0 = arith.constant 0 : i32
    %c0_i32_1 = arith.constant 0 : i32
    return %c0_i32, %c0_i32_0 : i32, i32
  }
  func.func @transform_5(%arg0: i32) -> (i32, i32, i32, i32) {
    %c0_i32 = arith.constant 0 : i32
    %c0_i32_0 = arith.constant 0 : i32
    %c0_i32_1 = arith.constant 0 : i32
    %c0_i32_2 = arith.constant 0 : i32
    return %arg0, %c0_i32, %c0_i32_0, %c0_i32_1 : i32, i32, i32, i32
  }
  func.func @transform_6(%arg0: i32) -> (i32, i32, i32, i32) {
    %c0_i32 = arith.constant 0 : i32
    %c0_i32_0 = arith.constant 0 : i32
    %c0_i32_1 = arith.constant 0 : i32
    %c0_i32_2 = arith.constant 0 : i32
    return %arg0, %c0_i32, %c0_i32_0, %c0_i32_1 : i32, i32, i32, i32
  }
}

</mosaic_0001>

<bundles_post_ra>
// kernel: tpu_custom_call.1
= control target key start
LH: loop header
LB: loop body
LE: loop exit
PB: predicated region body
PF: predicated region fallthrough
CT: control target
= control target key end

     0   :  { %12 = vsyncpa [#allocation3], 0  ;;  %s4932_s0 = inlined_call_operand.vmem [shape: bf16[4,10,18,2], index: 0, kind: input, shape index: {}]   ;;  %s4933_s1 = inlined_call_operand.vmem [shape: bf16[4,10,18,4], index: 1, kind: input, shape index: {}]   ;;  %s4934_s2 = inlined_call_operand.vmem [shape: bf16[18,16], index: 2, kind: input, shape index: {}]   ;;  %s4935_s3 = inlined_call_operand.vmem [shape: bf16[36,16], index: 3, kind: input, shape index: {}]   ;;  %s4936_s4 = inlined_call_operand.vmem [shape: f32[3,16], index: 4, kind: input, shape index: {}]   ;;  %s4937_s5 = inlined_call_operand.hbm [shape: bf16[4,8,16,16], index: 5, kind: output, shape index: {0}]   ;;  %s4938_s6 = inlined_call_operand.hbm [shape: bf16[4,4,8,16], index: 6, kind: output, shape index: {1}]  }
   0x1   :  { %14 = vsyncpa [#allocation3 + $0x1], 0 }
   0x2   :  { %15 = vsyncpa [#allocation5], 0 }
   0x3   :  { %17 = vsyncpa [#allocation5 + $0x1], 0  ;;  %s3479_s21 = smov 0   ;;  %s3481_s22 = smov 0  }
   0x4   :  { %s3483_s23 = smov 0   ;;  %s3485_s24 = smov 0  }
   0x5 LB: > { %s3500_s25 = sadd.s32 4294967295, %s3426_s24   ;;  %s2949_s26 = sadd.s32 4294967294, %s3426_s24   ;;  %s3426_s24 = sphi %s3485_s24, %s4954_s24   ;;  %s3422_s23 = sphi %s3483_s23, %s4953_s23   ;;  %s3418_s22 = sphi %s3481_s22, %s4952_s22   ;;  %s3414_s21 = sphi %s3479_s21, %s4951_s21  }
   0x6   : > { %s3504_s27 = sadd.s32 1, %s3426_s24   ;;  %s145_s28 = sadd.s32 1, %s3422_s23 }
   0x7   : > { %s142_s29 = ssub.s32 %s3426_s24, %s3504_s27  ;;  %p155_p0 = scmp.ne.s32.totalorder %s3422_s23, %s3418_s22 }
   0x8   : > { %p143_p1 = scmp.eq.s32.totalorder %s142_s29, 0  ;;  %p156_p2 = scmp.eq.s32.totalorder %s3500_s25, 3 }
   0x9   : > { %p161_p3 = scmp.ne.s32.totalorder %s3418_s22, %s3414_s21  ;;  %p162_p4 = scmp.eq.s32.totalorder %s2949_s26, 3 }
   0xa   : > { %s3515_s30 = scalar_select %p143_p1, %s3422_s23, %s145_s28  }
   0xb   : > { %p3517_p5 = por %p156_p2, %p155_p0  ;;  %p3521_p6 = por %p162_p4, %p161_p3 }
   0xc   : > { %p2952_p7 = scmp.ge.s32.totalorder %s3426_s24, 1  ;;  %p231_p8 = scmp.lt.s32.totalorder %s3426_s24, 5 }
   0xe   : > { %p232_p9 = pnand %p2952_p7, %p231_p8 }
   0xf   : > { %p271_p10 = scmp.lt.s32.totalorder (!%p232_p9), %s3500_s25, 3  ;;  %vm531_vm0 = vcmask (!%p232_p9), 1042432   ;;  %vm532_vm1 = vcmask (!%p232_p9), 1046532   ;;  %s4939_s17 = smov (!%p232_p9), 6   ;;  %vm312_vm3 = vsmask.f32 (!%p232_p9), 3328 }
  0x10   : > { %235 = sbr.rel (%p232_p9) target bundleno = 696 (0x2b8), region = 40  ;;  %vm3546_vm2 = vmor (!%p232_p9), %vm531_vm0, %vm532_vm1  ;;  %vm313_vm4 = vsmask.f32 (!%p232_p9), 7440  ;;  %s3429_s18 = smov (!%p232_p9), 4   ;;  %vm1915_vm6 = vcmask (!%p232_p9), 1040384   ;;  %vm1788_vm7 = vcmask (!%p232_p9), 1041408  }
  0x11   : > { %s3430_s19 = smov (!%p232_p9), 8   ;;  %vm3637_vm5 = vmor (!%p232_p9), %vm312_vm3, %vm313_vm4  ;;  %s3431_s20 = smov (!%p232_p9), 12   ;;  %vm876_vm8 = vcmask (!%p232_p9), 15360   ;;  %vm901_vm9 = vcmask (!%p232_p9), 31744   ;;  %vm935_vm10 = vcmask (!%p232_p9), 64512   ;;  %vm918_vm11 = vcmask (!%p232_p9), 48128  }
  0x12   : > { %s3432_s26 = smov (!%p232_p9), 2   ;;  %s3433_s28 = smov (!%p232_p9), 16   ;;  %vm969_vm12 = vcmask (!%p232_p9), 97280   ;;  %vm1003_vm13 = vcmask (!%p232_p9), 130048   ;;  %vm952_vm14 = vcmask (!%p232_p9), 80896   ;;  %vm1683_vm15 = vcmask (!%p232_p9), 162816  }
  0x13   : > { %s3434_s29 = smov (!%p232_p9), 10   ;;  %s3438_s14 = smov (!%p232_p9), 28   ;;  %vm1700_vm0 = vcmask (!%p232_p9), 195584   ;;  %vm986_vm1 = vcmask (!%p232_p9), 113664   ;;  %vm1717_vm3 = vcmask (!%p232_p9), 228352   ;;  %vm1898_vm4 = vcmask (!%p232_p9), 146432  }
  0x14   : > { %s4941_s15 = smov (!%p232_p9), 32   ;;  %s4949_s11 = smov (!%p232_p9), 6  }
  0x17   : > { %s272_s9 = scalar_select %p271_p10, %s3500_s25, 3 }
  0x19   : > { %s3248_s10 = smul.u32 120, %s272_s9  ;;  %s3435_s9 = smov 20  }
  0x1b   : > { %s3532_s13 = scalar_lea.vmem %s4932_s0, %s3248_s10  ;;  %s3556_s16 = scalar_lea.vmem %s4933_s1, %s3248_s10 }
  0x1c   : > { %v285_v0 = vld [vmem:[%s3532_s13 + $0xc] sm:$0xf]  ;;  %v3536_v1 = vld [vmem:[%s3532_s13 + $0x10] sm:$0xf]  ;;  %v3539_v2 = vld [vmem:[%s3532_s13 + $0x14] sm:$0x1] }
  0x1d   : > { %v349_v3 = vshll.u32 %v3536_v1, 16  ;;  %v353_v4 = vshrl.u32 %v3536_v1, 16  ;;  %v3544_v5 = vcombine.low %v285_v0, %v3536_v1  ;;  %v340_v6 = vshrl.u32 %v285_v0, 16  ;;  %v3551_v8 = vld [vmem:[%s3532_s13] sm:$0xf]  ;;  %s3436_s10 = smov 24  }
  0x1e   : > { %v343_v9 = vshll.u32 %v285_v0, 16  ;;  %v359_v10 = vshll.u32 %v3539_v2, 16  ;;  %v2958_v11 = vrot.slane %v285_v0, 9  ;;  %v543_v12 = vrot.slane %v3536_v1, 5  ;;  %v3561_v13 = vld [vmem:[%s3532_s13 + $0x4] sm:$0xf] }
  0x1f   : > { %v3563_v14 = vrot.slane %v353_v4, 4  ;;  %765 = vrot.lane.b32.xlu1 %v3544_v5, %s4939_s17  ;;  %v342_v15 = vrot.slane %v340_v6, 4  ;;  %v546_v16 = vrot.slane %v3539_v2, 5  ;;  %v284_v17 = vld [vmem:[%s3532_s13 + $0x8] sm:$0x1]  ;;  %v2957_v18 = vrot.slane %v3551_v8, 9 }
  0x20   : > { %v345_v19 = vrot.slane %v343_v9, 5  ;;  %v544_v20 = vsel %vm3546_vm2, %v2958_v11, %v543_v12  ;;  %v545_v21 = vrot.slane %v543_v12, 4  ;;  %v536_v22 = vrot.slane %v3561_v13, 5  ;;  %v3574_v23 = vld [vmem:[%s3556_s16 + $0xc] sm:$0xf] }
  0x21   : > { %v539_v24 = vrot.slane %v284_v17, 5  ;;  %v3577_v25 = vld [vmem:[%s3556_s16 + $0x10] sm:$0xf]  ;;  %v3580_v26 = vld [vmem:[%s3556_s16 + $0x14] sm:$0x1]  ;;  %v2998_v27 = vrot.slane %v3574_v23, 9 }
  0x22   : > { %v547_v28 = vsel %vm3546_vm2, %v545_v21, %v546_v16  ;;  %v537_v29 = vsel %vm3546_vm2, %v2957_v18, %v536_v22  ;;  %v538_v30 = vrot.slane %v536_v22, 4  ;;  %v1278_v31 = vrot.slane %v3577_v25, 5  ;;  %v3589_v32 = vld [vmem:[%s3556_s16] sm:$0xf]  ;;  %v3592_v33 = vld [vmem:[%s3556_s16 + $0x4] sm:$0xf] }
  0x23   : > { %v3594_v34 = vcombine.low %v544_v20, %v547_v28  ;;  %v1281_v35 = vrot.slane %v3580_v26, 5  ;;  %v3598_v36 = vld [vmem:[%s3556_s16 + $0x8] sm:$0x1]  ;;  %v2997_v37 = vrot.slane %v3589_v32, 9  ;;  %v1271_v38 = vrot.slane %v3592_v33, 5 }
  0x24   : > { %v540_v39 = vsel %vm3546_vm2, %v538_v30, %v539_v24  ;;  %v1279_v40 = vsel %vm3546_vm2, %v2998_v27, %v1278_v31  ;;  %v1280_v41 = vrot.slane %v1278_v31, 4  ;;  %v1274_v42 = vrot.slane %v3598_v36, 5 }
  0x25   : > { %748 = vrot.lane.b32.xlu0 %v3594_v34, %s3429_s18  ;;  %v2983_v43 = vcombine.low %v537_v29, %v540_v39  ;;  %v1272_v44 = vsel %vm3546_vm2, %v2997_v37, %v1271_v38  ;;  %v1273_v45 = vrot.slane %v1271_v38, 4  ;;  %v3613_v46 = vcombine.low %v3574_v23, %v3577_v25  ;;  %v3658_v38 = vld [vmem:[%s3532_s13 + $0x18] sm:$0xf] }
  0x26   : > { %v1282_v47 = vsel %vm3546_vm2, %v1280_v41, %v1281_v35  ;;  %v316_v48 = vshrl.u32 %v3551_v8, 16  ;;  %v319_v49 = vshll.u32 %v3551_v8, 16  ;;  %v325_v50 = vshll.u32 %v3561_v13, 16 }
  0x27   : > { %746 = vrot.lane.b32.xlu1 %v2983_v43, %s3429_s18  ;;  %v3621_v51 = vcombine.low %v1279_v40, %v1282_v47  ;;  %v1275_v52 = vsel %vm3546_vm2, %v1273_v45, %v1274_v42  ;;  %v329_v53 = vshrl.u32 %v3561_v13, 16  ;;  %v335_v54 = vshll.u32 %v284_v17, 16  ;;  %v3662_v43 = vld [vmem:[%s3532_s13 + $0x1c] sm:$0xf] }
  0x28   : > { %v3023_v55 = vcombine.low %v1272_v44, %v1275_v52  ;;  %v318_v56 = vrot.slane %v316_v48, 4  ;;  %v321_v57 = vrot.slane %v319_v49, 5  ;;  %v327_v58 = vrot.slane %v325_v50, 5  ;;  %v3670_v48 = vld [vmem:[%s3556_s16 + $0x18] sm:$0xf] }
  0x29   : > { %1483 = vrot.lane.b32.xlu0 %v3621_v51, %s3430_s19  ;;  %v331_v59 = vrot.slane %v329_v53, 4  ;;  %v337_v60 = vrot.slane %v335_v54, 5  ;;  %v346_v61 = vor.u32 %v345_v19, %v342_v15  ;;  %v351_v62 = vrot.slane %v349_v3, 5  ;;  %v3676_v54 = vld [vmem:[%s3556_s16 + $0x1c] sm:$0xf] }
  0x2a   : > { %v322_v63 = vor.u32 %v321_v57, %v318_v56  ;;  %v361_v0 = vrot.slane %v359_v10, 5  ;;  %v1054_v4 = vshrl.u32 %v3589_v32, 16  ;;  %v1057_v6 = vshll.u32 %v3589_v32, 16 }
  0x2b   : > { %1481 = vrot.lane.b32.xlu1 %v3023_v55, %s3430_s19  ;;  %v332_v11 = vor.u32 %v331_v59, %v327_v58  ;;  %v347_v12 = vrot.slane %v346_v61, 4  ;;  %v356_v1 = vor.u32 %v3563_v14, %v351_v62  ;;  %v1063_v3 = vshll.u32 %v3592_v33, 16 }
  0x2c   : > { %v323_v2 = vrot.slane %v322_v63, 4  ;;  %v1056_v10 = vrot.slane %v1054_v4, 4  ;;  %v1059_v15 = vrot.slane %v1057_v6, 5  ;;  %v1067_v16 = vshrl.u32 %v3592_v33, 16  ;;  %v290_v63 = vld [vmem:[%s3532_s13 + $0x20] sm:$0x1] }
  0x2d   : > { %v333_v17 = vrot.slane %v332_v11, 4  ;;  %v352_v18 = vsel %vm3637_vm5, %v347_v12, %v351_v62  ;;  %v357_v19 = vrot.slane %v356_v1, 4  ;;  %v1065_v20 = vrot.slane %v1063_v3, 5 }
  0x2e   : > { %v328_v21 = vsel %vm3637_vm5, %v323_v2, %v327_v58  ;;  %v1060_v22 = vor.u32 %v1059_v15, %v1056_v10  ;;  %v1069_v24 = vrot.slane %v1067_v16, 4  ;;  %v1073_v14 = vshll.u32 %v3598_v36, 16 }
  0x2f   : > { %1500 = vrot.lane.b32.xlu1 %v3613_v46, %s3431_s20  ;;  %v338_v27 = vsel %vm3637_vm5, %v333_v17, %v337_v60  ;;  %v362_v28 = vsel %vm3637_vm5, %v357_v19, %v361_v0  ;;  %v1078_v29 = vshrl.u32 %v3574_v23, 16  ;;  %v1081_v30 = vshll.u32 %v3574_v23, 16 }
  0x30   : > { %v2975_v31 = vcombine.low %v328_v21, %v338_v27  ;;  %v2976_v35 = vcombine.low %v352_v18, %v362_v28  ;;  %v1061_v37 = vrot.slane %v1060_v22, 4  ;;  %v1070_v36 = vor.u32 %v1069_v24, %v1065_v20  ;;  %v1031_v18 = vld [vmem:[%s3556_s16 + $0x20] sm:$0x1] }
  0x31   : > { %v1075_v39 = vrot.slane %v1073_v14, 5  ;;  %v1080_v40 = vrot.slane %v1078_v29, 4  ;;  %v1083_v41 = vrot.slane %v1081_v30, 5  ;;  %v1087_v42 = vshll.u32 %v3577_v25, 16 }
  0x32   : > { %706 = vrot.lane.b32.xlu0 %v2975_v31, %s3432_s26  ;;  %v1066_v23 = vsel %vm3637_vm5, %v1061_v37, %v1065_v20  ;;  %v1071_v44 = vrot.slane %v1070_v36, 4  ;;  %v1091_v45 = vshrl.u32 %v3577_v25, 16  ;;  %v1097_v47 = vshll.u32 %v3580_v26, 16 }
  0x33   : > { %708 = vrot.lane.b32.xlu1 %v2976_v35, %s3432_s26  ;;  %v1084_v49 = vor.u32 %v1083_v41, %v1080_v40  ;;  %v1089_v50 = vrot.slane %v1087_v42, 5  ;;  %v364_v52 = vshrl.u32 %v3658_v38, 16  ;;  %v367_v53 = vshll.u32 %v3658_v38, 16 }
  0x34   : > { %v1076_v55 = vsel %vm3637_vm5, %v1071_v44, %v1075_v39  ;;  %v1093_v56 = vrot.slane %v1091_v45, 4  ;;  %v377_v25 = vshrl.u32 %v3662_v43, 16  ;;  %v1102_v58 = vshrl.u32 %v3670_v48, 16 }
  0x35   : > { %v3015_v26 = vcombine.low %v1066_v23, %v1076_v55  ;;  %v1085_v57 = vrot.slane %v1084_v49, 4  ;;  %v1099_v60 = vrot.slane %v1097_v47, 5  ;;  %v1105_v61 = vshll.u32 %v3670_v48, 16  ;;  %v3722_v49 = vld [vmem:[%s3532_s13 + $0x24] sm:$0xf] }
  0x36   : > { %v1094_v59 = vor.u32 %v1093_v56, %v1089_v50  ;;  %v1115_v62 = vshrl.u32 %v3676_v54, 16  ;;  %v366_v0 = vrot.slane %v364_v52, 4  ;;  %v369_v4 = vrot.slane %v367_v53, 5  ;;  %v3729_v52 = vld [vmem:[%s3532_s13 + $0x28] sm:$0xf] }
  0x37   : > { %1441 = vrot.lane.b32.xlu0 %v3015_v26, %s3429_s18  ;;  %784 = vrot.lane.b32.xlu1 %v2976_v35, %s3430_s19  ;;  %v373_v6 = vshll.u32 %v3662_v43, 16  ;;  %v1090_v11 = vsel %vm3637_vm5, %v1085_v57, %v1089_v50  ;;  %v379_v1 = vrot.slane %v377_v25, 4  ;;  %v383_v2 = vshll.u32 %v290_v63, 16 }
  0x38   : > { %v1095_v12 = vrot.slane %v1094_v59, 4  ;;  %v1104_v10 = vrot.slane %v1102_v58, 4  ;;  %v1111_v15 = vshll.u32 %v3676_v54, 16  ;;  %v370_v17 = vor.u32 %v369_v4, %v366_v0 }
  0x39   : > { %v375_v3 = vrot.slane %v373_v6, 5  ;;  %v1107_v19 = vrot.slane %v1105_v61, 5  ;;  %v1117_v20 = vrot.slane %v1115_v62, 4  ;;  %v3698_v14 = vcombine.low %v3658_v38, %v3662_v43 }
  0x3a   : > { %v1100_v16 = vsel %vm3637_vm5, %v1095_v12, %v1099_v60  ;;  %v1113_v24 = vrot.slane %v1111_v15, 5  ;;  %v385_v27 = vrot.slane %v383_v2, 5  ;;  %v1121_v28 = vshll.u32 %v1031_v18, 16  ;;  %v3750_v60 = vld [vmem:[%s3556_s16 + $0x28] sm:$0xf]  ;;  %v3321_v15 = vld [vmem:[%s4935_s3] sm:$0xff]  }
  0x3b   : > { %v3016_v21 = vcombine.low %v1090_v11, %v1100_v16  ;;  %v380_v22 = vor.u32 %v379_v1, %v375_v3  ;;  %v371_v29 = vrot.slane %v370_v17, 4  ;;  %v1108_v31 = vor.u32 %v1107_v19, %v1104_v10  ;;  %v293_v10 = vld [vmem:[%s3532_s13 + $0x2c] sm:$0x1]  ;;  %v3322_v16 = vld [vmem:[%s4934_s2] sm:$0xff]   ;;  %3188 = vmatprep.subr.bf16.mxu1 %v3321_v15 }
  0x3c   : > { %v1118_v35 = vor.u32 %v1117_v20, %v1113_v24  ;;  %v3706_v37 = vcombine.low %v3670_v48, %v3676_v54  ;;  %v1123_v36 = vrot.slane %v1121_v28, 5  ;;  %v550_v39 = vrot.slane %v3662_v43, 5  ;;  %3210 = vmatprep.subr.bf16.mxu0 %v3322_v16  ;;  %3189 = vmatpush3.bf16.msra.mxu1 %v3321_v15 }
  0x3d   : > { %1443 = vrot.lane.b32.xlu0 %v3016_v21, %s3429_s18  ;;  %1519 = vrot.lane.b32.xlu1 %v3016_v21, %s3433_s28  ;;  %v381_v30 = vrot.slane %v380_v22, 4  ;;  %v376_v40 = vsel %vm3637_vm5, %v371_v29, %v375_v3  ;;  %v1109_v42 = vrot.slane %v1108_v31, 4  ;;  %v2959_v44 = vrot.slane %v3658_v38, 9 }
  0x3e   : > { %v1119_v23 = vrot.slane %v1118_v35, 4  ;;  %v552_v43 = vrot.slane %v550_v39, 4  ;;  %v553_v45 = vrot.slane %v290_v63, 5  ;;  %v1285_v47 = vrot.slane %v3676_v54, 5  ;;  %3211 = vmatpush3.bf16.msra.mxu0 %v3322_v16  ;;  %v296_v16 = vld [vmem:[%s3532_s13 + $0x38] sm:$0x1] }
  0x3f   : > { %v386_v41 = vsel %vm3637_vm5, %v381_v30, %v385_v27  ;;  %v1114_v50 = vsel %vm3637_vm5, %v1109_v42, %v1113_v24  ;;  %v2999_v53 = vrot.slane %v3670_v48, 9  ;;  %v388_v55 = vshrl.u32 %v3722_v49, 16  ;;  %v3746_v48 = vld [vmem:[%s3556_s16 + $0x24] sm:$0xf]  ;;  %v1034_v27 = vld [vmem:[%s3556_s16 + $0x2c] sm:$0x1] }
  0x40   : > { %v1124_v38 = vsel %vm3637_vm5, %v1119_v23, %v1123_v36  ;;  %v391_v54 = vshll.u32 %v3722_v49, 16  ;;  %v554_v25 = vsel %vm3546_vm2, %v552_v43, %v553_v45  ;;  %v1287_v26 = vrot.slane %v1285_v47, 4  ;;  %v3323_v30 = vld [vmem:[%s4935_s3 + $0x8] sm:$0xff]  }
  0x41   : > { %767 = vrot.lane.b32.xlu0 %v3698_v14, %s4939_s17  ;;  %803 = vrot.lane.b32.xlu1 %v3594_v34, %s3434_s29  ;;  %v3718_v34 = vcombine.low %v376_v40, %v386_v41  ;;  %v3740_v56 = vcombine.low %v1114_v50, %v1124_v38  ;;  %v1288_v57 = vrot.slane %v1031_v18, 5  ;;  %v401_v58 = vshrl.u32 %v3729_v52, 16  ;;  %s3437_s17 = smov 14  }
  0x42   : > { %v397_v59 = vshll.u32 %v3729_v52, 16  ;;  %v390_v62 = vrot.slane %v388_v55, 4  ;;  %v393_v63 = vrot.slane %v391_v54, 5  ;;  %v1286_v0 = vsel %vm3546_vm2, %v2999_v53, %v1285_v47  ;;  %3190 = vmatprep.subr.bf16.mxu1 %v3323_v30 }
  0x43   : > { %v1289_v4 = vsel %vm3546_vm2, %v1287_v26, %v1288_v57  ;;  %v1126_v6 = vshrl.u32 %v3746_v48, 16  ;;  %v1129_v11 = vshll.u32 %v3746_v48, 16  ;;  %v1139_v12 = vshrl.u32 %v3750_v60, 16  ;;  %3191 = vmatpush3.bf16.msra.mxu1 %v3323_v30 }
  0x44   : > { %v399_v1 = vrot.slane %v397_v59, 5  ;;  %v403_v3 = vrot.slane %v401_v58, 4  ;;  %v1135_v2 = vshll.u32 %v3750_v60, 16  ;;  %v394_v17 = vor.u32 %v393_v63, %v390_v62 }
  0x45   : > { %1502 = vrot.lane.b32.xlu0 %v3706_v37, %s3431_s20  ;;  %1538 = vrot.lane.b32.xlu1 %v3621_v51, %s3435_s9  ;;  %v551_v51 = vsel %vm3546_vm2, %v2959_v44, %v550_v39  ;;  %v3025_v18 = vcombine.low %v1286_v0, %v1289_v4  ;;  %v557_v19 = vrot.slane %v3729_v52, 5  ;;  %v1128_v20 = vrot.slane %v1126_v6, 4  ;;  %v3837_v4 = vld [vmem:[%s3532_s13 + $0x30] sm:$0xf]  ;;  %v3840_v6 = vld [vmem:[%s3532_s13 + $0x34] sm:$0xf] }
  0x46   : > { %v3752_v61 = vcombine.low %v551_v51, %v554_v25  ;;  %v1131_v21 = vrot.slane %v1129_v11, 5  ;;  %v404_v22 = vor.u32 %v403_v3, %v399_v1  ;;  %v407_v24 = vshll.u32 %v293_v10, 16  ;;  %v3324_v3 = vld [vmem:[%s4934_s2 + $0x8] ss:$0 sps:$4 sm:$0x11]  }
  0x47   : > { %v1137_v28 = vrot.slane %v1135_v2, 5  ;;  %v1141_v29 = vrot.slane %v1139_v12, 4  ;;  %v3784_v31 = vcombine.low %v3722_v49, %v3729_v52  ;;  %v395_v35 = vrot.slane %v394_v17, 4  ;;  %v3851_v12 = vld [vmem:[%s3556_s16 + $0x34] sm:$0xf]  ;;  %3247 = vmatprep.subr.msk.bf16.mxu0 %vm1915_vm6, %v3324_v3 }
  0x48   : > { %v2960_v36 = vrot.slane %v3722_v49, 9  ;;  %v559_v39 = vrot.slane %v557_v19, 4  ;;  %v560_v40 = vrot.slane %v293_v10, 5  ;;  %v1132_v41 = vor.u32 %v1131_v21, %v1128_v20 }
  0x49   : > { %786 = vrot.lane.b32.xlu0 %v3718_v34, %s3430_s19  ;;  %822 = vrot.lane.b32.xlu1 %v3698_v14, %s3431_s20  ;;  %v1145_v42 = vshll.u32 %v1034_v27, 16  ;;  %v405_v23 = vrot.slane %v404_v22, 4  ;;  %v409_v44 = vrot.slane %v407_v24, 5  ;;  %v1142_v43 = vor.u32 %v1141_v29, %v1137_v28  ;;  %v3325_v22 = vld [vmem:[%s4935_s3 + $0x10] ss:$0 sps:$4 sm:$0x33]  }
  0x4a   : > { %v1292_v45 = vrot.slane %v3750_v60, 5  ;;  %v3793_v47 = vcombine.low %v3746_v48, %v3750_v60  ;;  %v400_v49 = vsel %vm3637_vm5, %v395_v35, %v399_v1  ;;  %v558_v50 = vsel %vm3546_vm2, %v2960_v36, %v557_v19  ;;  %v1037_v36 = vld [vmem:[%s3556_s16 + $0x38] sm:$0x1]  ;;  %3246 = vmatprep.subr.msk.bf16.mxu1 %vm1788_vm7, %v3325_v22 }
  0x4b   : > { %v561_v38 = vsel %vm3546_vm2, %v559_v39, %v560_v40  ;;  %v1133_v52 = vrot.slane %v1132_v41, 4  ;;  %v1147_v51 = vrot.slane %v1145_v42, 5  ;;  %v3000_v53 = vrot.slane %v3746_v48, 9 }
  0x4c   : > { %v410_v55 = vsel %vm3637_vm5, %v405_v23, %v409_v44  ;;  %v1143_v54 = vrot.slane %v1142_v43, 4  ;;  %v1294_v25 = vrot.slane %v1292_v45, 4  ;;  %v1295_v26 = vrot.slane %v1034_v27, 5 }
  0x4d   : > { %1521 = vrot.lane.b32.xlu0 %v3740_v56, %s3433_s28  ;;  %1557 = vrot.lane.b32.xlu1 %v3706_v37, %s3436_s10  ;;  %v2978_v57 = vcombine.low %v400_v49, %v410_v55  ;;  %v3811_v58 = vcombine.low %v558_v50, %v561_v38  ;;  %v1138_v48 = vsel %vm3637_vm5, %v1133_v52, %v1137_v28  ;;  %v415_v11 = vshll.u32 %v3837_v4, 16 }
  0x4e   : > { %v1148_v59 = vsel %vm3637_vm5, %v1143_v54, %v1147_v51  ;;  %v1293_v60 = vsel %vm3546_vm2, %v3000_v53, %v1292_v45  ;;  %v1296_v62 = vsel %vm3546_vm2, %v1294_v25, %v1295_v26  ;;  %v421_v1 = vshll.u32 %v3840_v6, 16 }
  0x4f   : > { %v3018_v63 = vcombine.low %v1138_v48, %v1148_v59  ;;  %v3824_v0 = vcombine.low %v1293_v60, %v1296_v62  ;;  %v1163_v15 = vshrl.u32 %v3851_v12, 16  ;;  %v1159_v21 = vshll.u32 %v3851_v12, 16  ;;  %v3902_v60 = vld [vmem:[%s3532_s13 + $0x3c] sm:$0xf] }
  0x50   : > { %v423_v19 = vrot.slane %v421_v1, 5  ;;  %v1917_v24 = vsel %vm1915_vm6, %v3324_v3, 0  ;;  %v431_v28 = vshll.u32 %v296_v16, 16  ;;  %v1790_v41 = vsel %vm1788_vm7, %v3325_v22, 0 }
  0x51   : > { %805 = vrot.lane.b32.xlu0 %v3752_v61, %s3434_s29  ;;  %841 = vrot.lane.b32.xlu1 %v3718_v34, %s3437_s17  ;;  %v1161_v39 = vrot.slane %v1159_v21, 5  ;;  %v1165_v40 = vrot.slane %v1163_v15, 4  ;;  %v3878_v42 = vcombine.low %v3837_v4, %v3840_v6  ;;  %v1169_v44 = vshll.u32 %v1037_v36, 16 }
  0x52   : > { %3213 = vmatpush3.bf16.msra.mxu0 %v1917_v24  ;;  %3193 = vmatpush3.bf16.msra.mxu1 %v1790_v41  ;;  %v433_v23 = vrot.slane %v431_v28, 5  ;;  %v564_v38 = vrot.slane %v3840_v6, 5  ;;  %v2961_v26 = vrot.slane %v3837_v4, 9  ;;  %v567_v48 = vrot.slane %v296_v16, 5  ;;  %v3928_v16 = vld [vmem:[%s3556_s16 + $0x40] sm:$0xf] }
  0x53   : > { %v1166_v50 = vor.u32 %v1165_v40, %v1161_v39  ;;  %v1171_v51 = vrot.slane %v1169_v44, 5  ;;  %v1299_v59 = vrot.slane %v3851_v12, 5  ;;  %v299_v24 = vld [vmem:[%s3532_s13 + $0x44] sm:$0x1]  ;;  %vm1734_vm6 = vcmask 261120  }
  0x54   : > { %vm1771_vm7 = vcmask 293888  }
  0x55   : > { %1540 = vrot.lane.b32.xlu0 %v3025_v18, %s3435_s9  ;;  %1576 = vrot.lane.b32.xlu1 %v3740_v56, %s3438_s14  ;;  %v1167_v25 = vrot.slane %v1166_v50, 4  ;;  %v1301_v3 = vrot.slane %v1299_v59, 4 }
  0x59   : > { %824 = vrot.lane.b32.xlu0 %v3784_v31, %s3431_s20  ;;  %860 = vrot.lane.b32.xlu1 %v3752_v61, %s3433_s28 }
  0x5d   : > { %1559 = vrot.lane.b32.xlu0 %v3793_v47, %s3436_s10  ;;  %1595 = vrot.lane.b32.xlu1 %v3025_v18, %s4941_s15 }
  0x61   : > { %843 = vrot.lane.b32.xlu0 %v2978_v57, %s3437_s17  ;;  %862 = vrot.lane.b32.xlu1 %v3811_v58, %s3433_s28 }
  0x65   : > { %1578 = vrot.lane.b32.xlu0 %v3018_v63, %s3438_s14  ;;  %1597 = vrot.lane.b32.xlu1 %v3824_v0, %s4941_s15  ;;  %s4950_s15 = smov 32  }
  0x69   : > { %710 = vrot.lane.b32.xlu0 %v3718_v34, %s3432_s26  ;;  %750 = vrot.lane.b32.xlu1 %v3752_v61, %s3429_s18  ;;  %v412_v34 = vshrl.u32 %v3837_v4, 16  ;;  %v3848_v61 = vld [vmem:[%s3556_s16 + $0x30] sm:$0xf]  ;;  %v298_v4 = vld [vmem:[%s3532_s13 + $0x40] sm:$0xf] }
  0x6a   : > { %v1150_v2 = vshrl.u32 %v3848_v61, 16  ;;  %v1153_v10 = vshll.u32 %v3848_v61, 16  ;;  %v3887_v52 = vcombine.low %v3848_v61, %v3851_v12  ;;  %v436_v12 = vshrl.u32 %v3902_v60, 16 }
  0x6b   : > { %v414_v17 = vrot.slane %v412_v34, 4  ;;  %v571_v41 = vrot.slane %v298_v4, 5  ;;  %v3951_v50 = vcombine.low %v3902_v60, %v298_v4 }
  0x6c   : > { %v1152_v29 = vrot.slane %v1150_v2, 4  ;;  %v1155_v30 = vrot.slane %v1153_v10, 5  ;;  %v449_v2 = vshrl.u32 %v298_v4, 16  ;;  %v445_v10 = vshll.u32 %v298_v4, 16 }
  0x6d   : > { %1445 = vrot.lane.b32.xlu0 %v3740_v56, %s3429_s18  ;;  %1485 = vrot.lane.b32.xlu1 %v3025_v18, %s3430_s19  ;;  %v425_v56 = vshrl.u32 %v3840_v6, 16  ;;  %v417_v18 = vrot.slane %v415_v11, 5  ;;  %v565_v6 = vsel %vm3546_vm2, %v2961_v26, %v564_v38  ;;  %v1302_v11 = vrot.slane %v1037_v36, 5 }
  0x6e   : > { %v1156_v49 = vor.u32 %v1155_v30, %v1152_v29  ;;  %v451_v28 = vrot.slane %v449_v2, 4  ;;  %v1187_v29 = vshrl.u32 %v3928_v16, 16  ;;  %v1183_v30 = vshll.u32 %v3928_v16, 16 }
  0x6f   : > { %v427_v20 = vrot.slane %v425_v56, 4  ;;  %v418_v27 = vor.u32 %v417_v18, %v414_v17  ;;  %v439_v56 = vshll.u32 %v3902_v60, 16  ;;  %v1303_v21 = vsel %vm3546_vm2, %v1301_v3, %v1302_v11 }
  0x70   : > { %v1157_v54 = vrot.slane %v1156_v49, 4  ;;  %v1189_v49 = vrot.slane %v1187_v29, 4  ;;  %v573_v26 = vrot.slane %v571_v41, 4 }
  0x71   : > { %712 = vrot.lane.b32.xlu0 %v2978_v57, %s3432_s26  ;;  %769 = vrot.lane.b32.xlu1 %v3784_v31, %s4949_s11  ;;  %v428_v35 = vor.u32 %v427_v20, %v423_v19  ;;  %v419_v43 = vrot.slane %v418_v27, 4  ;;  %v441_v20 = vrot.slane %v439_v56, 5  ;;  %v447_v27 = vrot.slane %v445_v10, 5 }
  0x72   : > { %v1162_v62 = vsel %vm3637_vm5, %v1157_v54, %v1161_v39  ;;  %v455_v39 = vshll.u32 %v299_v24, 16  ;;  %v574_v54 = vrot.slane %v299_v24, 5 }
  0x73   : > { %v429_v45 = vrot.slane %v428_v35, 4  ;;  %v424_v53 = vsel %vm3637_vm5, %v419_v43, %v423_v19  ;;  %v438_v19 = vrot.slane %v436_v12, 4  ;;  %v452_v40 = vor.u32 %v451_v28, %v447_v27  ;;  %v1040_v43 = vld [vmem:[%s3556_s16 + $0x44] sm:$0x1] }
  0x74   : > { %v575_v11 = vsel %vm3546_vm2, %v573_v26, %v574_v54 }
  0x75   : > { %1447 = vrot.lane.b32.xlu0 %v3018_v63, %s3429_s18  ;;  %1504 = vrot.lane.b32.xlu1 %v3793_v47, %s3431_s20  ;;  %v434_v55 = vsel %vm3637_vm5, %v429_v45, %v433_v23  ;;  %v442_v36 = vor.u32 %v441_v20, %v438_v19  ;;  %v1185_v45 = vrot.slane %v1183_v30, 5 }
  0x79   : > { %752 = vrot.lane.b32.xlu0 %v3811_v58, %s3429_s18  ;;  %788 = vrot.lane.b32.xlu1 %v2978_v57, %s3430_s19  ;;  %v566_v57 = vrot.slane %v564_v38, 4 }
  0x7b   : > { %v568_v34 = vsel %vm3546_vm2, %v566_v57, %v567_v48  ;;  %v1193_v48 = vshll.u32 %v1040_v43, 16 }
  0x7c   : > { %v3925_v15 = vcombine.low %v565_v6, %v568_v34 }
  0x7d   : > { %1487 = vrot.lane.b32.xlu0 %v3824_v0, %s3430_s19  ;;  %1523 = vrot.lane.b32.xlu1 %v3018_v63, %s3433_s28  ;;  %v1172_v63 = vsel %vm3637_vm5, %v1167_v25, %v1171_v51  ;;  %v443_v51 = vrot.slane %v442_v36, 4  ;;  %v453_v25 = vrot.slane %v452_v40, 4  ;;  %v1195_v56 = vrot.slane %v1193_v48, 5 }
  0x7e   : > { %v3920_v1 = vcombine.low %v1162_v62, %v1172_v63  ;;  %v1306_v62 = vrot.slane %v3928_v16, 5 }
  0x80   : > { %v1308_v10 = vrot.slane %v1306_v62, 4 }
  0x81   : > { %771 = vrot.lane.b32.xlu0 %v3878_v42, %s4949_s11  ;;  %807 = vrot.lane.b32.xlu1 %v3811_v58, %s3434_s29  ;;  %v3898_v58 = vcombine.low %v424_v53, %v434_v55  ;;  %v457_v53 = vrot.slane %v455_v39, 5  ;;  %v2962_v55 = vrot.slane %v3902_v60, 9  ;;  %v448_v60 = vsel %vm3637_vm5, %v443_v51, %v447_v27 }
  0x83   : > { %v572_v6 = vsel %vm3546_vm2, %v2962_v55, %v571_v41  ;;  %v458_v34 = vsel %vm3637_vm5, %v453_v25, %v457_v53  ;;  %v4027_v41 = vld [vmem:[%s3532_s13 + $0x48] sm:$0xf] }
  0x84   : > { %v3988_v19 = vcombine.low %v572_v6, %v575_v11 }
  0x85   : > { %1506 = vrot.lane.b32.xlu0 %v3887_v52, %s3431_s20  ;;  %1542 = vrot.lane.b32.xlu1 %v3824_v0, %s3435_s9  ;;  %v3001_v0 = vrot.slane %v3848_v61, 9  ;;  %v3923_v61 = vld [vmem:[%s3556_s16 + $0x3c] sm:$0xf] }
  0x86   : > { %v1174_v18 = vshrl.u32 %v3923_v61, 16  ;;  %v1177_v22 = vshll.u32 %v3923_v61, 16  ;;  %v3963_v63 = vcombine.low %v3923_v61, %v3928_v16  ;;  %v3002_v2 = vrot.slane %v3923_v61, 9 }
  0x87   : > { %v1300_v17 = vsel %vm3546_vm2, %v3001_v0, %v1299_v59  ;;  %v1190_v59 = vor.u32 %v1189_v49, %v1185_v45  ;;  %v1309_v16 = vrot.slane %v1040_v43, 5 }
  0x88   : > { %v3943_v35 = vcombine.low %v1300_v17, %v1303_v21  ;;  %v1176_v23 = vrot.slane %v1174_v18, 4  ;;  %v1179_v44 = vrot.slane %v1177_v22, 5  ;;  %v2980_v17 = vcombine.low %v448_v60, %v458_v34 }
  0x89   : > { %790 = vrot.lane.b32.xlu0 %v3898_v58, %s3430_s19  ;;  %826 = vrot.lane.b32.xlu1 %v3878_v42, %s3431_s20  ;;  %v1191_v3 = vrot.slane %v1190_v59, 4  ;;  %v1307_v22 = vsel %vm3546_vm2, %v3002_v2, %v1306_v62  ;;  %v1310_v24 = vsel %vm3546_vm2, %v1308_v10, %v1309_v16 }
  0x8a   : > { %v1180_v57 = vor.u32 %v1179_v44, %v1176_v23  ;;  %v4005_v29 = vcombine.low %v1307_v22, %v1310_v24  ;;  %v4081_v22 = vld [vmem:[%s3556_s16 + $0x50] sm:$0x1]  ;;  %v2967_v24 = vcombine.low %v3551_v8, %v3561_v13  ;;  %v3007_v13 = vcombine.low %v3589_v32, %v3592_v33 }
  0x8b   : > { %v1196_v61 = vsel %vm3637_vm5, %v1191_v3, %v1195_v56  ;;  %v1217_v8 = vshll.u32 %v4081_v22, 16 }
  0x8c   : > { %v1181_v12 = vrot.slane %v1180_v57, 4  ;;  %v4060_v57 = vld [vmem:[%s3532_s13 + $0x50] sm:$0x1] }
  0x8d   : > { %1525 = vrot.lane.b32.xlu0 %v3920_v1, %s3433_s28  ;;  %1561 = vrot.lane.b32.xlu1 %v3887_v52, %s3436_s10  ;;  %v479_v56 = vshll.u32 %v4060_v57, 16  ;;  %v581_v33 = vrot.slane %v4060_v57, 5 }
  0x8e   : > { %v1186_v21 = vsel %vm3637_vm5, %v1181_v12, %v1185_v45  ;;  %v4046_v45 = vld [vmem:[%s3556_s16 + $0x4c] sm:$0xf] }
  0x8f   : > { %v3020_v27 = vcombine.low %v1186_v21, %v1196_v61  ;;  %v1211_v25 = vshrl.u32 %v4046_v45, 16  ;;  %v1207_v60 = vshll.u32 %v4046_v45, 16 }
  0x91   : > { %809 = vrot.lane.b32.xlu0 %v3925_v15, %s3434_s29  ;;  %845 = vrot.lane.b32.xlu1 %v3898_v58, %s3437_s17  ;;  %v3953_v38 = vpop.permute.xlu1 %765  ;;  %v4074_v10 = vrot.slane %v1207_v60, 5  ;;  %v1213_v16 = vrot.slane %v1211_v25, 4  ;;  %v1313_v60 = vrot.slane %v4046_v45, 5 }
  0x95   : > { %1544 = vrot.lane.b32.xlu0 %v3943_v35, %s3435_s9  ;;  %1580 = vrot.lane.b32.xlu1 %v3920_v1, %s3438_s14 }
  0x97   : > { %v3965_v4 = vpop.permute.xlu0 %748 }
  0x99   : > { %828 = vrot.lane.b32.xlu0 %v3951_v50, %s3431_s20  ;;  %864 = vrot.lane.b32.xlu1 %v3925_v15, %s3433_s28  ;;  %v3975_v0 = vpop.permute.xlu1 %746 }
  0x9b   : > { %v3990_v20 = vpop.permute.xlu0 %1483 }
  0x9d   : > { %1563 = vrot.lane.b32.xlu0 %v3963_v63, %s3436_s10  ;;  %1599 = vrot.lane.b32.xlu1 %v3943_v35, %s4950_s15  ;;  %v3986_v18 = vpop.permute.xlu1 %1481 }
  0xa1   : > { %847 = vrot.lane.b32.xlu0 %v2980_v17, %s3437_s17  ;;  %866 = vrot.lane.b32.xlu1 %v3988_v19, %s3433_s28  ;;  %v4003_v28 = vpop.permute.xlu1 %1500 }
  0xa4   : > { %v4007_v30 = vpop.permute.xlu0 %706 }
  0xa5   : > { %1582 = vrot.lane.b32.xlu0 %v3020_v27, %s3438_s14  ;;  %1601 = vrot.lane.b32.xlu1 %v4005_v29, %s4950_s15  ;;  %v4012_v36 = vpop.permute.xlu1 %708 }
  0xa9   : > { %714 = vrot.lane.b32.xlu0 %v3898_v58, %s3432_s26  ;;  %v4016_v39 = vpop.permute.xlu0 %1441  ;;  %754 = vrot.lane.b32.xlu1 %v3925_v15, %s3429_s18  ;;  %v4020_v40 = vpop.permute.xlu1 %784  ;;  %v4034_v58 = vld [vmem:[%s3532_s13 + $0x4c] sm:$0xf]  ;;  %v460_v15 = vshrl.u32 %v4027_v41, 16 }
  0xaa   : > { %v473_v43 = vshrl.u32 %v4034_v58, 16  ;;  %v469_v49 = vshll.u32 %v4034_v58, 16 }
  0xab   : > { %v462_v26 = vrot.slane %v460_v15, 4 }
  0xac   : > { %v4062_v59 = vrot.slane %v469_v49, 5  ;;  %v475_v62 = vrot.slane %v473_v43, 4  ;;  %v578_v43 = vrot.slane %v4034_v58, 5 }
  0xad   : > { %1449 = vrot.lane.b32.xlu0 %v3920_v1, %s3429_s18  ;;  %1489 = vrot.lane.b32.xlu1 %v3943_v35, %s3430_s19  ;;  %v4041_v1 = vld [vmem:[%s3556_s16 + $0x48] sm:$0xf]  ;;  %v463_v35 = vshll.u32 %v4027_v41, 16 }
  0xae   : > { %v1198_v55 = vshrl.u32 %v4041_v1, 16  ;;  %v1201_v54 = vshll.u32 %v4041_v1, 16  ;;  %v476_v2 = vor.u32 %v475_v62, %v4062_v59  ;;  %v879_v62 = vsel %vm876_vm8, %v2967_v24, %v4007_v30 }
  0xaf   : > { %v4029_v23 = vpop.permute.xlu0 %1443  ;;  %v4031_v44 = vpop.permute.xlu1 %1519  ;;  %v465_v48 = vrot.slane %v463_v35, 5  ;;  %v481_v35 = vrot.slane %v479_v56, 5  ;;  %v580_v32 = vrot.slane %v578_v43, 4  ;;  %v903_v57 = vsel %vm901_vm9, %v879_v62, %v3975_v0  ;;  %v4180_v62 = vld [vmem:[%s3556_s16 + $0x54] sm:$0xf] }
  0xb0   : > { %v1200_v11 = vrot.slane %v1198_v55, 4  ;;  %v1203_v12 = vrot.slane %v1201_v54, 5  ;;  %v477_v55 = vrot.slane %v476_v2, 4  ;;  %v1214_v54 = vor.u32 %v1213_v16, %v4074_v10  ;;  %v4128_v2 = vld [vmem:[%s3532_s13 + $0x54] sm:$0xf] }
  0xb1   : > { %716 = vrot.lane.b32.xlu0 %v2980_v17, %s3432_s26  ;;  %773 = vrot.lane.b32.xlu1 %v3951_v50, %s4949_s11  ;;  %v466_v3 = vor.u32 %v465_v48, %v462_v26  ;;  %v2963_v48 = vrot.slane %v4027_v41, 9  ;;  %v1613_v16 = vsel %vm901_vm9, %v3007_v13, %v4016_v39  ;;  %v582_v24 = vsel %vm3546_vm2, %v580_v32, %v581_v33  ;;  %v4183_v32 = vld [vmem:[%s3556_s16 + $0x58] sm:$0xf] }
  0xb2   : > { %v1204_v15 = vor.u32 %v1203_v12, %v1200_v11  ;;  %v482_v30 = vsel %vm3637_vm5, %v477_v55, %v481_v35  ;;  %v1215_v11 = vrot.slane %v1214_v54, 4  ;;  %v1219_v12 = vrot.slane %v1217_v8, 5 }
  0xb3   : > { %v4049_v51 = vpop.permute.xlu0 %767  ;;  %v4051_v53 = vpop.permute.xlu1 %803  ;;  %v467_v49 = vrot.slane %v466_v3, 4  ;;  %v1316_v3 = vrot.slane %v4081_v22, 5  ;;  %v487_v55 = vshll.u32 %v4128_v2, 16 }
  0xb4   : > { %v1205_v26 = vrot.slane %v1204_v15, 4  ;;  %v1220_v39 = vsel %vm3637_vm5, %v1215_v11, %v1219_v12  ;;  %v920_v15 = vsel %vm918_vm11, %v903_v57, %v3953_v38  ;;  %v882_v57 = vsel %vm876_vm8, %v3544_v5, %v4012_v36 }
  0xb5   : > { %1451 = vrot.lane.b32.xlu0 %v3020_v27, %s3429_s18  ;;  %1508 = vrot.lane.b32.xlu1 %v3963_v63, %s3431_s20  ;;  %v937_v54 = vsel %vm935_vm10, %v920_v15, %v4020_v40  ;;  %v489_v12 = vrot.slane %v487_v55, 5  ;;  %v1222_v5 = vshrl.u32 %v4180_v62, 16  ;;  %v1225_v36 = vshll.u32 %v4180_v62, 16 }
  0xb6   : > { %v1210_v22 = vsel %vm3637_vm5, %v1205_v26, %v4074_v10  ;;  %v1636_v10 = vsel %vm935_vm10, %v1613_v16, %v3986_v18  ;;  %v954_v13 = vsel %vm952_vm14, %v937_v54, %v4051_v53  ;;  %v4198_v16 = vld [vmem:[%s3532_s13 + $0x5c] sm:$0x1] }
  0xb7   : > { %v4065_v6 = vpop.permute.xlu0 %1502  ;;  %v4067_v34 = vpop.permute.xlu1 %1538  ;;  %v4168_v26 = vcombine.low %v1210_v22, %v1220_v39  ;;  %v905_v22 = vsel %vm901_vm9, %v882_v57, %v3965_v4 }
  0xb8   : > { %v922_v54 = vsel %vm918_vm11, %v905_v22, %v4049_v51 }
  0xb9   : > { %756 = vrot.lane.b32.xlu0 %v3988_v19, %s3429_s18  ;;  %792 = vrot.lane.b32.xlu1 %v2980_v17, %s3430_s19  ;;  %v4090_v17 = vcombine.low %v4027_v41, %v4034_v58  ;;  %v4103_v58 = vcombine.low %v4041_v1, %v4046_v45  ;;  %v472_v41 = vsel %vm3637_vm5, %v467_v49, %v4062_v59  ;;  %v3003_v59 = vrot.slane %v4041_v1, 9 }
  0xba   : > { %v579_v45 = vsel %vm3546_vm2, %v2963_v48, %v578_v43  ;;  %v4136_v0 = vcombine.low %v472_v41, %v482_v30  ;;  %v1315_v1 = vrot.slane %v1313_v60, 4  ;;  %v4150_v43 = vld [vmem:[%s3532_s13 + $0x58] sm:$0xf]  ;;  %v484_v49 = vshrl.u32 %v4128_v2, 16 }
  0xbb   : > { %v4076_v21 = vpop.permute.xlu0 %786  ;;  %v4078_v61 = vpop.permute.xlu1 %822  ;;  %v4158_v8 = vcombine.low %v579_v45, %v582_v24  ;;  %v1314_v38 = vsel %vm3546_vm2, %v3003_v59, %v1313_v60  ;;  %v497_v48 = vshrl.u32 %v4150_v43, 16  ;;  %v4177_v53 = vcombine.low %v4128_v2, %v4150_v43 }
  0xbc   : > { %v1317_v18 = vsel %vm3546_vm2, %v1315_v1, %v1316_v3  ;;  %v971_v40 = vsel %vm969_vm12, %v954_v13, %v4078_v61  ;;  %v493_v33 = vshll.u32 %v4150_v43, 16  ;;  %v1652_v60 = vsel %vm969_vm12, %v1636_v10, %v4003_v28 }
  0xbd   : > { %1491 = vrot.lane.b32.xlu0 %v4005_v29, %s3430_s19  ;;  %1527 = vrot.lane.b32.xlu1 %v3020_v27, %s3433_s28  ;;  %v486_v11 = vrot.slane %v484_v49, 4  ;;  %v1668_v45 = vsel %vm1003_vm13, %v1652_v60, %v4031_v44  ;;  %v4195_v3 = vcombine.low %v1314_v38, %v1317_v18  ;;  %v1235_v44 = vshrl.u32 %v4183_v32, 16 }
  0xbe   : > { %v1685_v28 = vsel %vm1683_vm15, %v1668_v45, %v4067_v34  ;;  %v4212_v24 = vrot.slane %v493_v33, 5  ;;  %v499_v34 = vrot.slane %v497_v48, 4  ;;  %v1231_v1 = vshll.u32 %v4183_v32, 16 }
  0xbf   : > { %v4097_v27 = vpop.permute.xlu0 %1521  ;;  %v4099_v25 = vpop.permute.xlu1 %1557  ;;  %v490_v55 = vor.u32 %v489_v12, %v486_v11  ;;  %v503_v10 = vshll.u32 %v4198_v16, 16  ;;  %v585_v13 = vrot.slane %v4150_v43, 5  ;;  %v939_v4 = vsel %vm935_vm10, %v922_v54, %v4076_v21  ;;  %v1046_v43 = vld [vmem:[%s3556_s16 + $0x5c] sm:$0x1] }
  0xc0   : > { %v1224_v18 = vrot.slane %v1222_v5, 4  ;;  %v500_v51 = vor.u32 %v499_v34, %v4212_v24  ;;  %v1237_v21 = vrot.slane %v1235_v44, 4  ;;  %v1320_v5 = vrot.slane %v4183_v32, 5 }
  0xc1   : > { %775 = vrot.lane.b32.xlu0 %v4090_v17, %s4949_s11  ;;  %811 = vrot.lane.b32.xlu1 %v3988_v19, %s3434_s29  ;;  %v491_v12 = vrot.slane %v490_v55, 4  ;;  %v587_v57 = vrot.slane %v585_v13, 4 }
  0xc3   : > { %v4119_v56 = vpop.permute.xlu0 %805  ;;  %v842_v19 = vpop.permute.xlu1 %841 }
  0xc4   : > { %v988_v41 = vsel %vm986_vm1, %v971_v40, %v842_v19  ;;  %v1702_v19 = vsel %vm1700_vm0, %v1685_v28, %v4099_v25  ;;  %v1616_v25 = vsel %vm901_vm9, %v3613_v46, %v4029_v23  ;;  %v1227_v46 = vrot.slane %v1225_v36, 5 }
  0xc5   : > { %1510 = vrot.lane.b32.xlu0 %v4103_v58, %s3431_s20  ;;  %1546 = vrot.lane.b32.xlu1 %v4005_v29, %s3435_s9  ;;  %v956_v23 = vsel %vm952_vm14, %v939_v4, %v4119_v56  ;;  %v1233_v40 = vrot.slane %v1231_v1, 5  ;;  %v1638_v48 = vsel %vm935_vm10, %v1616_v25, %v3990_v20  ;;  %v1323_v25 = vrot.slane %v1046_v43, 5 }
  0xc6   : > { %v1654_v56 = vsel %vm969_vm12, %v1638_v48, %v4065_v6 }
  0xc7   : > { %v4147_v35 = vpop.permute.xlu0 %1540  ;;  %v1577_v29 = vpop.permute.xlu1 %1576  ;;  %v1670_v45 = vsel %vm1003_vm13, %v1654_v56, %v4097_v27  ;;  %v1238_v28 = vor.u32 %v1237_v21, %v1233_v40 }
  0xc8   : > { %v1719_v39 = vsel %vm1717_vm3, %v1702_v19, %v1577_v29  ;;  %v2964_v29 = vrot.slane %v4128_v2, 9  ;;  %v505_v2 = vrot.slane %v503_v10, 5  ;;  %v1687_v6 = vsel %vm1683_vm15, %v1670_v45, %v4147_v35 }
  0xc9   : > { %794 = vrot.lane.b32.xlu0 %v4136_v0, %s3430_s19  ;;  %830 = vrot.lane.b32.xlu1 %v4090_v17, %s3431_s20  ;;  %v4259_v19 = vcombine.low %v4180_v62, %v4183_v32  ;;  %v496_v35 = vsel %vm3637_vm5, %v491_v12, %v4212_v24  ;;  %v1239_v55 = vrot.slane %v1238_v28, 4  ;;  %v1322_v10 = vrot.slane %v1320_v5, 4 }
  0xca   : > { %v586_v1 = vsel %vm3546_vm2, %v2964_v29, %v585_v13 }
  0xcb   : > { %v825_v30 = vpop.permute.xlu0 %824  ;;  %v861_v61 = vpop.permute.xlu1 %860 }
  0xcc   : > { %v1005_v59 = vsel %vm1003_vm13, %v988_v41, %v861_v61  ;;  %v973_v33 = vsel %vm969_vm12, %v956_v23, %v825_v30  ;;  %v588_v61 = vrot.slane %v4198_v16, 5  ;;  %v1228_v30 = vor.u32 %v1227_v46, %v1224_v18 }
  0xcd   : > { %1529 = vrot.lane.b32.xlu0 %v4168_v26, %s3433_s28  ;;  %1565 = vrot.lane.b32.xlu1 %v4103_v58, %s3436_s10  ;;  %v501_v16 = vrot.slane %v500_v51, 4  ;;  %v1324_v46 = vsel %vm3546_vm2, %v1322_v10, %v1323_v25 }
  0xce   : > { %3214 = vmatprep.mubr.msk.bf16.mxu0 %vm1898_vm4, %v1005_v59  ;;  %v1241_v59 = vshll.u32 %v1046_v43, 16  ;;  %v589_v22 = vsel %vm3546_vm2, %v587_v57, %v588_v61  ;;  %v1229_v32 = vrot.slane %v1228_v30, 4  ;;  %v4329_v61 = vld [vmem:[%s3532_s13 + $0x60] sm:$0xf]  ;;  %v4348_v57 = vld [vmem:[%s3556_s16 + $0x64] sm:$0xf] }
  0xcf   : > { %v1560_v15 = vpop.permute.xlu0 %1559  ;;  %v1596_v49 = vpop.permute.xlu1 %1595  ;;  %v506_v24 = vsel %vm3637_vm5, %v501_v16, %v505_v2  ;;  %v1339_v16 = vshrl.u32 %v4348_v57, 16 }
  0xd0   : > { %v1736_v38 = vsel %vm1734_vm6, %v1719_v39, %v1596_v49  ;;  %v1704_v27 = vsel %vm1700_vm0, %v1687_v6, %v1560_v15  ;;  %v1243_v15 = vrot.slane %v1241_v59, 5  ;;  %v3004_v49 = vrot.slane %v4180_v62, 9 }
  0xd1   : > { %813 = vrot.lane.b32.xlu0 %v4158_v8, %s3434_s29  ;;  %849 = vrot.lane.b32.xlu1 %v4136_v0, %s3437_s17  ;;  %v2982_v13 = vcombine.low %v496_v35, %v506_v24  ;;  %v4286_v62 = vcombine.low %v586_v1, %v589_v22  ;;  %v1234_v4 = vsel %vm3637_vm5, %v1229_v32, %v1233_v40  ;;  %v4371_v24 = vld [vmem:[%s3556_s16 + $0x68] sm:$0x1]  ;;  %v1341_v10 = vrot.slane %v1339_v16, 4 }
  0xd2   : > { %3194 = vmatprep.mubr.msk.bf16.mxu1 %vm1771_vm7, %v1736_v38  ;;  %v1244_v29 = vsel %vm3637_vm5, %v1239_v55, %v1243_v15  ;;  %v1321_v18 = vsel %vm3546_vm2, %v3004_v49, %v1320_v5  ;;  %v308_v5 = vld [vmem:[%s3532_s13 + $0x68] sm:$0x1] }
  0xd3   : > { %v844_v60 = vpop.permute.xlu0 %843  ;;  %v863_v41 = vpop.permute.xlu1 %862  ;;  %v3022_v43 = vcombine.low %v1234_v4, %v1244_v29  ;;  %v4303_v40 = vcombine.low %v1321_v18, %v1324_v46  ;;  %v610_v32 = vshll.u32 %v308_v5, 16 }
  0xd4   : > { %v990_v11 = vsel %vm986_vm1, %v973_v33, %v844_v60 }
  0xd5   : > { %1548 = vrot.lane.b32.xlu0 %v4195_v3, %s3435_s9  ;;  %v1007_v20 = vsel %vm1003_vm13, %v990_v11, %v863_v41  ;;  %1584 = vrot.lane.b32.xlu1 %v4168_v26, %s3438_s14 }
  0xd6   : > { %3215 = vmatmul.mubr.msk.bf16.vlgmr.msra.gmra.mrb[0].mxu0 %vm1898_vm4, %v1007_v20 }
  0xd7   : > { %v1579_v36 = vpop.permute.xlu0 %1578  ;;  %v1598_v44 = vpop.permute.xlu1 %1597 }
  0xd8   : > { %v1721_v34 = vsel %vm1717_vm3, %v1704_v27, %v1579_v36 }
  0xd9   : > { %832 = vrot.lane.b32.xlu0 %v4177_v53, %s3431_s20  ;;  %v1738_v39 = vsel %vm1734_vm6, %v1721_v34, %v1598_v44  ;;  %868 = vrot.lane.b32.xlu1 %v4158_v8, %s3433_s28  ;;  %v1335_v34 = vshll.u32 %v4348_v57, 16 }
  0xda   : > { %3195 = vmatmul.mubr.msk.bf16.vlgmr.msra.gmra.mrb[0].mxu1 %vm1771_vm7, %v1738_v39 }
  0xdb   : > { %v4278_v54 = vpop.permute.xlu0 %710  ;;  %v4280_v38 = vpop.permute.xlu1 %750  ;;  %v1337_v55 = vrot.slane %v1335_v34, 5 }
  0xdd   : > { %1567 = vrot.lane.b32.xlu0 %v4259_v19, %s3436_s10  ;;  %1603 = vrot.lane.b32.xlu1 %v4195_v3, %s4950_s15 }
  0xdf   : > { %v4296_v23 = vpop.permute.xlu0 %1445  ;;  %v4298_v51 = vpop.permute.xlu1 %1485 }
  0xe1   : > { %851 = vrot.lane.b32.xlu0 %v2982_v13, %s3437_s17  ;;  %870 = vrot.lane.b32.xlu1 %v4286_v62, %s3433_s28 }
  0xe3   : > { %v4305_v21 = vpop.permute.xlu0 %712  ;;  %v4307_v48 = vpop.permute.xlu1 %769 }
  0xe5   : > { %1586 = vrot.lane.b32.xlu0 %v3022_v43, %s3438_s14  ;;  %1605 = vrot.lane.b32.xlu1 %v4303_v40, %s4950_s15 }
  0xe7   : > { %v4312_v33 = vpop.permute.xlu0 %1447  ;;  %v4314_v60 = vpop.permute.xlu1 %1504 }
  0xe9   : > { %718 = vrot.lane.b32.xlu0 %v4136_v0, %s3432_s26  ;;  %758 = vrot.lane.b32.xlu1 %v4158_v8, %s3429_s18  ;;  %v4336_v0 = vld [vmem:[%s3532_s13 + $0x64] sm:$0xf]  ;;  %v591_v8 = vshrl.u32 %v4329_v61, 16 }
  0xea   : > { %v604_v12 = vshrl.u32 %v4336_v0, 16  ;;  %v600_v45 = vshll.u32 %v4336_v0, 16  ;;  %v2991_v18 = vcombine.low %v4329_v61, %v4336_v0  ;;  %v619_v46 = vrot.slane %v4336_v0, 5 }
  0xeb   : > { %v4320_v41 = vpop.permute.xlu0 %752  ;;  %v4322_v2 = vpop.permute.xlu1 %788  ;;  %v593_v28 = vrot.slane %v591_v8, 4 }
  0xec   : > { %v602_v36 = vrot.slane %v600_v45, 5  ;;  %v606_v44 = vrot.slane %v604_v12, 4  ;;  %v612_v12 = vrot.slane %v610_v32, 5  ;;  %v1342_v45 = vor.u32 %v1341_v10, %v1337_v55  ;;  %v4407_v10 = vld [vmem:[%s3532_s13 + $0x70] sm:$0xf] }
  0xed   : > { %1453 = vrot.lane.b32.xlu0 %v4168_v26, %s3429_s18  ;;  %1493 = vrot.lane.b32.xlu1 %v4195_v3, %s3430_s19  ;;  %v4343_v26 = vld [vmem:[%s3556_s16 + $0x60] sm:$0xf]  ;;  %v594_v3 = vshll.u32 %v4329_v61, 16  ;;  %v621_v0 = vrot.slane %v619_v46, 4 }
  0xee   : > { %v1326_v59 = vshrl.u32 %v4343_v26, 16  ;;  %v1329_v6 = vshll.u32 %v4343_v26, 16  ;;  %v607_v49 = vor.u32 %v606_v44, %v602_v36 }
  0xef   : > { %v4331_v56 = vpop.permute.xlu0 %1487  ;;  %v4333_v11 = vpop.permute.xlu1 %1523  ;;  %v596_v27 = vrot.slane %v594_v3, 5 }
  0xf0   : > { %v1328_v22 = vrot.slane %v1326_v59, 4  ;;  %v1331_v39 = vrot.slane %v1329_v6, 5  ;;  %v608_v3 = vrot.slane %v607_v49, 4 }
  0xf1   : > { %720 = vrot.lane.b32.xlu0 %v2982_v13, %s3432_s26  ;;  %777 = vrot.lane.b32.xlu1 %v4177_v53, %s4949_s11  ;;  %v597_v15 = vor.u32 %v596_v27, %v593_v28  ;;  %v2965_v28 = vrot.slane %v4329_v61, 9  ;;  %v622_v27 = vrot.slane %v308_v5, 5  ;;  %v1354_v5 = vrot.slane %v4348_v57, 5  ;;  %s3441_s26 = smov [#allocation2]  }
  0xf2   : > { %v1332_v29 = vor.u32 %v1331_v39, %v1328_v22  ;;  %v613_v34 = vsel %vm3637_vm5, %v608_v3, %v612_v12  ;;  %v1343_v22 = vrot.slane %v1342_v45, 4  ;;  %v638_v3 = vshrl.u32 %v4407_v10, 16 }
  0xf3   : > { %v4351_v20 = vpop.permute.xlu0 %771  ;;  %v4353_v30 = vpop.permute.xlu1 %807  ;;  %v598_v8 = vrot.slane %v597_v15, 4  ;;  %v4399_v15 = vld [vmem:[%s3532_s13 + $0x6c] sm:$0xf]  ;;  %v620_v49 = vsel %vm3546_vm2, %v2965_v28, %v619_v46  ;;  %v634_v12 = vshll.u32 %v4407_v10, 16  ;;  %v1356_v28 = vrot.slane %v1354_v5, 4 }
  0xf4   : > { %v1333_v16 = vrot.slane %v1332_v29, 4  ;;  %v625_v46 = vshrl.u32 %v4399_v15, 16 }
  0xf5   : > { %1455 = vrot.lane.b32.xlu0 %v3022_v43, %s3429_s18  ;;  %1512 = vrot.lane.b32.xlu1 %v4259_v19, %s3431_s20  ;;  %v603_v44 = vsel %vm3637_vm5, %v598_v8, %v602_v36  ;;  %v885_v36 = vsel %vm876_vm8, %v3698_v14, %v4278_v54  ;;  %v628_v8 = vshll.u32 %v4399_v15, 16 }
  0xf6   : > { %v2992_v29 = vcombine.low %v603_v44, %v613_v34  ;;  %v4445_v44 = vld [vmem:[%s3556_s16 + $0x6c] sm:$0xf] }
  0xf7   : > { %v4363_v35 = vpop.permute.xlu0 %1506  ;;  %v4365_v1 = vpop.permute.xlu1 %1542 }
  0xf9   : > { %760 = vrot.lane.b32.xlu0 %v4286_v62, %s3429_s18  ;;  %796 = vrot.lane.b32.xlu1 %v2982_v13, %s3430_s19  ;;  %v1345_v13 = vshll.u32 %v4371_v24, 16 }
  0xfb   : > { %v4373_v25 = vpop.permute.xlu0 %790  ;;  %v827_v4 = vpop.permute.xlu1 %826  ;;  %v1347_v39 = vrot.slane %v1345_v13, 5  ;;  %v907_v13 = vsel %vm901_vm9, %v885_v36, %v4280_v38 }
  0xfc   : > { %v924_v14 = vsel %vm918_vm11, %v907_v13, %v4307_v48  ;;  %v1619_v48 = vsel %vm901_vm9, %v3706_v37, %v4296_v23  ;;  %v4451_v37 = vld [vmem:[%s3556_s16 + $0x70] sm:$0xf]  ;;  %v627_v23 = vrot.slane %v625_v46, 4  ;;  %v4464_v13 = vld [vmem:[%s3532_s13 + $0x74] sm:$0x1]  ;;  %v888_v46 = vsel %vm876_vm8, %v3784_v31, %v4305_v21 }
  0xfd   : > { %1495 = vrot.lane.b32.xlu0 %v4303_v40, %s3430_s19  ;;  %1531 = vrot.lane.b32.xlu1 %v3022_v43, %s3433_s28  ;;  %v3031_v43 = vcombine.low %v4343_v26, %v4348_v57  ;;  %v1348_v57 = vsel %vm3637_vm5, %v1343_v22, %v1347_v39  ;;  %v941_v38 = vsel %vm935_vm10, %v924_v14, %v4322_v2  ;;  %v1357_v2 = vrot.slane %v4371_v24, 5 }
  0xfe   : > { %v4456_v24 = vrot.slane %v634_v12, 5  ;;  %v644_v31 = vshll.u32 %v4464_v13, 16 }
  0xff   : > { %v4382_v59 = vpop.permute.xlu0 %1525  ;;  %v4384_v6 = vpop.permute.xlu1 %1561 }
 0x101   : > { %779 = vrot.lane.b32.xlu0 %v2991_v18, %s4949_s11  ;;  %815 = vrot.lane.b32.xlu1 %v4286_v62, %s3434_s29  ;;  %v1338_v62 = vsel %vm3637_vm5, %v1333_v16, %v1337_v55  ;;  %v623_v55 = vsel %vm3546_vm2, %v621_v0, %v622_v27  ;;  %v3005_v16 = vrot.slane %v4343_v26, 9  ;;  %v958_v0 = vsel %vm952_vm14, %v941_v38, %v4353_v30  ;;  %s3165_s11 = sshll.u32 %s3500_s25, 10 }
 0x102   : > { %v4431_v45 = vcombine.low %v620_v49, %v623_v55  ;;  %v4441_v27 = vcombine.low %v1338_v62, %v1348_v57  ;;  %v1640_v26 = vsel %vm935_vm10, %v1619_v48, %v4298_v51  ;;  %v975_v34 = vsel %vm969_vm12, %v958_v0, %v827_v4 }
 0x103   : > { %v4396_v61 = vpop.permute.xlu0 %809  ;;  %v846_v32 = vpop.permute.xlu1 %845  ;;  %v630_v30 = vrot.slane %v628_v8, 5  ;;  %v1656_v22 = vsel %vm969_vm12, %v1640_v26, %v4314_v60  ;;  %v640_v49 = vrot.slane %v638_v3, 4  ;;  %v1360_v4 = vshrl.u32 %v4445_v44, 16  ;;  %v1052_v26 = vld [vmem:[%s3556_s16 + $0x74] sm:$0x1]  ;;  %s4820_s16 = scalar_lea.hbm %s4937_s5, %s3165_s11 }
 0x104   : > { %v1672_v36 = vsel %vm1003_vm13, %v1656_v22, %v4333_v11  ;;  %v1363_v55 = vshll.u32 %v4445_v44, 16  ;;  %v1373_v11 = vshrl.u32 %v4451_v37, 16  ;;  %v1369_v57 = vshll.u32 %v4451_v37, 16 }
 0x105   : > { %1514 = vrot.lane.b32.xlu0 %v3031_v43, %s3431_s20  ;;  %1550 = vrot.lane.b32.xlu1 %v4303_v40, %s3435_s9  ;;  %v1689_v60 = vsel %vm1683_vm15, %v1672_v36, %v4365_v1  ;;  %v1358_v1 = vsel %vm3546_vm2, %v1356_v28, %v1357_v2  ;;  %v641_v38 = vor.u32 %v640_v49, %v4456_v24 }
 0x106   : > { %v1706_v8 = vsel %vm1700_vm0, %v1689_v60, %v4384_v6  ;;  %v1365_v28 = vrot.slane %v1363_v55, 5  ;;  %v1375_v0 = vrot.slane %v1373_v11, 4  ;;  %v1622_v2 = vsel %vm901_vm9, %v3793_v47, %v4312_v33 }
 0x107   : > { %v4425_v54 = vpop.permute.xlu0 %1544  ;;  %v1581_v40 = vpop.permute.xlu1 %1580  ;;  %v642_v47 = vrot.slane %v641_v38, 4  ;;  %v1391_v60 = vrot.slane %v1052_v26, 5 }
 0x108   : > { %v1723_v14 = vsel %vm1717_vm3, %v1706_v8, %v1581_v40  ;;  %v1371_v40 = vrot.slane %v1369_v57, 5 }
 0x109   : > { %798 = vrot.lane.b32.xlu0 %v2992_v29, %s3430_s19  ;;  %834 = vrot.lane.b32.xlu1 %v2991_v18, %s3431_s20  ;;  %v992_v18 = vsel %vm986_vm1, %v975_v34, %v846_v32  ;;  %v1355_v32 = vsel %vm3546_vm2, %v3005_v16, %v1354_v5  ;;  %v909_v5 = vsel %vm901_vm9, %v888_v46, %v4320_v41  ;;  %v1362_v16 = vrot.slane %v1360_v4, 4 }
 0x10a   : > { %v926_v21 = vsel %vm918_vm11, %v909_v5, %v4351_v20  ;;  %v3033_v41 = vcombine.low %v1355_v32, %v1358_v1  ;;  %v1388_v34 = vrot.slane %v4451_v37, 5 }
 0x10b   : > { %v829_v39 = vpop.permute.xlu0 %828  ;;  %v865_v62 = vpop.permute.xlu1 %864  ;;  %v943_v48 = vsel %vm935_vm10, %v926_v21, %v4373_v25  ;;  %v2994_v25 = vcombine.low %v4399_v15, %v4407_v10  ;;  %v1366_v49 = vor.u32 %v1365_v28, %v1362_v16  ;;  %v2966_v21 = vrot.slane %v4399_v15, 9 }
 0x10c   : > { %v1009_v51 = vsel %vm1003_vm13, %v992_v18, %v865_v62  ;;  %v960_v20 = vsel %vm952_vm14, %v943_v48, %v4396_v61  ;;  %v646_v62 = vrot.slane %v644_v31, 5  ;;  %v1390_v55 = vrot.slane %v1388_v34, 4 }
 0x10d   : > { %1533 = vrot.lane.b32.xlu0 %v4441_v27, %s3433_s28  ;;  %1569 = vrot.lane.b32.xlu1 %v3031_v43, %s3436_s10  ;;  %v631_v43 = vor.u32 %v630_v30, %v627_v23  ;;  %v977_v23 = vsel %vm969_vm12, %v960_v20, %v829_v39  ;;  %v1376_v39 = vor.u32 %v1375_v0, %v1371_v40  ;;  %v1367_v1 = vrot.slane %v1366_v49, 4 }
 0x10e   : > { %3218 = vmatprep.mubr.msk.bf16.mxu0 %vm1898_vm4, %v1009_v51  ;;  %v1379_v51 = vshll.u32 %v1052_v26, 16  ;;  %v647_v8 = vsel %vm3637_vm5, %v642_v47, %v646_v62  ;;  %v656_v16 = vrot.slane %v4464_v13, 5 }
 0x10f   : > { %v1564_v3 = vpop.permute.xlu0 %1563  ;;  %v1600_v12 = vpop.permute.xlu1 %1599  ;;  %v632_v18 = vrot.slane %v631_v43, 4  ;;  %v1377_v5 = vrot.slane %v1376_v39, 4 }
 0x110   : > { %v1740_v6 = vsel %vm1734_vm6, %v1723_v14, %v1600_v12  ;;  %v1381_v43 = vrot.slane %v1379_v51, 5  ;;  %v1372_v12 = vsel %vm3637_vm5, %v1367_v1, %v1371_v40 }
 0x111   : > { %817 = vrot.lane.b32.xlu0 %v4431_v45, %s3434_s29  ;;  %853 = vrot.lane.b32.xlu1 %v2992_v29, %s3437_s17  ;;  %v1642_v29 = vsel %vm935_vm10, %v1622_v2, %v4331_v56  ;;  %v637_v46 = vsel %vm3637_vm5, %v632_v18, %v4456_v24  ;;  %v653_v24 = vrot.slane %v4407_v10, 5 }
 0x112   : > { %3198 = vmatprep.mubr.msk.bf16.mxu1 %vm1771_vm7, %v1740_v6  ;;  %v1658_v33 = vsel %vm969_vm12, %v1642_v29, %v4363_v35  ;;  %v3006_v35 = vrot.slane %v4445_v44, 9  ;;  %v1382_v31 = vsel %vm3637_vm5, %v1377_v5, %v1381_v43  ;;  %vm2376_vm5 = vcmask 123904  }
 0x113   : > { %v848_v30 = vpop.permute.xlu0 %847  ;;  %v867_v22 = vpop.permute.xlu1 %866  ;;  %v1674_v36 = vsel %vm1003_vm13, %v1658_v33, %v4382_v59  ;;  %v655_v6 = vrot.slane %v653_v24, 4  ;;  %v3035_v48 = vcombine.low %v1372_v12, %v1382_v31 }
 0x114   : > { %v994_v61 = vsel %vm986_vm1, %v977_v23, %v848_v30  ;;  %v1691_v4 = vsel %vm1683_vm15, %v1674_v36, %v4425_v54 }
 0x115   : > { %1552 = vrot.lane.b32.xlu0 %v3033_v41, %s3435_s9  ;;  %v1011_v56 = vsel %vm1003_vm13, %v994_v61, %v867_v22  ;;  %1588 = vrot.lane.b32.xlu1 %v4441_v27, %s3438_s14  ;;  %v1708_v59 = vsel %vm1700_vm0, %v1691_v4, %v1564_v3  ;;  %v3034_v27 = vcombine.low %v4445_v44, %v4451_v37 }
 0x116   : > { %3219 = vmatmul.mubr.msk.bf16.gmra.mrb[4].mxu0 %vm1898_vm4, %v1011_v56  ;;  %v1389_v44 = vsel %vm3546_vm2, %v3006_v35, %v1388_v34  ;;  %v1392_v37 = vsel %vm3546_vm2, %v1390_v55, %v1391_v60  ;;  %v657_v40 = vsel %vm3546_vm2, %v655_v6, %v656_v16 }
 0x117   : > { %v1583_v32 = vpop.permute.xlu0 %1582  ;;  %v1602_v11 = vpop.permute.xlu1 %1601  ;;  %v3036_v38 = vcombine.low %v1389_v44, %v1392_v37 }
 0x118   : > { %v1725_v57 = vsel %vm1717_vm3, %v1708_v59, %v1583_v32 }
 0x119   : > { %836 = vrot.lane.b32.xlu0 %v2994_v25, %s3431_s20  ;;  %v1742_v54 = vsel %vm1734_vm6, %v1725_v57, %v1602_v11  ;;  %872 = vrot.lane.b32.xlu1 %v4431_v45, %s3433_s28  ;;  %v2995_v45 = vcombine.low %v637_v46, %v647_v8 }
 0x11a   : > { %3199 = vmatmul.mubr.msk.bf16.gmra.mrb[4].mxu1 %vm1771_vm7, %v1742_v54 }
 0x11b   : > { %v715_v14 = vpop.permute.xlu0 %714  ;;  %v755_v3 = vpop.permute.xlu1 %754 }
 0x11c   : > { %v891_v49 = vsel %vm876_vm8, %v3878_v42, %v715_v14 }
 0x11d   : > { %1571 = vrot.lane.b32.xlu0 %v3034_v27, %s3436_s10  ;;  %1607 = vrot.lane.b32.xlu1 %v3033_v41, %s4950_s15  ;;  %v654_v41 = vsel %vm3546_vm2, %v2966_v21, %v653_v24  ;;  %v911_v36 = vsel %vm901_vm9, %v891_v49, %v755_v3  ;;  %vm2159_vm2 = vcmask 125952  }
 0x11e   : > { %v2996_v15 = vcombine.low %v654_v41, %v657_v40 }
 0x11f   : > { %v1450_v10 = vpop.permute.xlu0 %1449  ;;  %v1490_v28 = vpop.permute.xlu1 %1489 }
 0x120   : > { %v1625_v35 = vsel %vm901_vm9, %v3887_v52, %v1450_v10 }
 0x121   : > { %855 = vrot.lane.b32.xlu0 %v2995_v45, %s3437_s17  ;;  %1609 = vrot.lane.b32.xlu1 %v3036_v38, %s4950_s15  ;;  %v1644_v60 = vsel %vm935_vm10, %v1625_v35, %v1490_v28  ;;  %s4644_s17 = sand.u32 1, %s3418_s22  }
 0x122   : > { %s2953_s29 = sshll.u32 %s4644_s17, 6  ;;  %s2954_s10 = sshll.u32 %s4644_s17, 4 }
 0x123   : > { %v717_v9 = vpop.permute.xlu0 %716  ;;  %v774_v0 = vpop.permute.xlu1 %773  ;;  %s4672_s9 = scalar_lea.vmem [#allocation2], %s2953_s29  ;;  %s2809_s19 = scalar_lea.sflag [#allocation3], %s4644_s17 }
 0x124   : > { %v928_v56 = vsel %vm918_vm11, %v911_v36, %v774_v0  ;;  %v894_v52 = vsel %vm876_vm8, %v3951_v50, %v717_v9  ;;  %s2827_s12 = sshll.u32 %s4672_s9, 4  ;;  %s4825_s12 = int_to_ptr.vmem [resolvable:$true] %s2827_s12 }
 0x125   : > { %1590 = vrot.lane.b32.xlu0 %v3035_v48, %s3438_s14  ;;  %s4704_s14 = scalar_lea.vmem [#allocation4], %s2954_s10  ;;  %s3332_s20 = scalar_lea.vmem %s4825_s12, 1024 }
 0x126   : > { %p3333_p11 = scmp.ne.s32.totalorder %s4825_s12, %s3332_s20 }
 0x127   : > { %v1452_v2 = vpop.permute.xlu0 %1451  ;;  %v1509_v13 = vpop.permute.xlu1 %1508 }
 0x128   : > { %v1660_v32 = vsel %vm969_vm12, %v1644_v60, %v1509_v13  ;;  %v1628_v3 = vsel %vm901_vm9, %v3963_v63, %v1452_v2  ;;  %p3334_p12 = pnand %p3333_p11, %p3517_p5 }
 0x129   : > { %874 = vrot.lane.b32.xlu0 %v2996_v15, %s3433_s28  ;;  %s3336_s28 = sshll.u32 %s3441_s26, 4  ;;  %s3337_s28 = int_to_ptr.vmem [resolvable:$false] %s3336_s28 }
 0x12a   : > { %p3335_p13 = pneg %p3334_p12  ;;  %s3338_s29 = scalar_lea.vmem %s3337_s28, 2048 }
 0x12b   : > { %v757_v20 = vpop.permute.xlu0 %756  ;;  %v793_v25 = vpop.permute.xlu1 %792  ;;  %p3339_p0 = scmp.lt.s32.totalorder %s4825_s12, %s3337_s28  ;;  %p3340_p1 = scmp.lt.s32.totalorder %s3338_s29, %s3332_s20 }
 0x12c   : > { %v945_v4 = vsel %vm935_vm10, %v928_v56, %v793_v25  ;;  %v913_v1 = vsel %vm901_vm9, %v894_v52, %v757_v20 }
 0x12d   : > { %p3341_p2 = por %p3340_p1, %p3339_p0 }
 0x12f   : > { %v1492_v26 = vpop.permute.xlu0 %1491  ;;  %v1528_v34 = vpop.permute.xlu1 %1527  ;;  %p3342_p3 = pnand %p3341_p2, %p3335_p13 }
 0x130   : > { %v1676_v27 = vsel %vm1003_vm13, %v1660_v32, %v1528_v34  ;;  %v1646_v45 = vsel %vm935_vm10, %v1628_v3, %v1492_v26 }
 0x133   : > { %v776_v29 = vpop.permute.xlu0 %775  ;;  %v812_v23 = vpop.permute.xlu1 %811 }
 0x134   : > { %v962_v55 = vsel %vm952_vm14, %v945_v4, %v812_v23  ;;  %v930_v37 = vsel %vm918_vm11, %v913_v1, %v776_v29 }
 0x137   : > { %v1511_v30 = vpop.permute.xlu0 %1510  ;;  %v1547_v22 = vpop.permute.xlu1 %1546 }
 0x138   : > { %v1693_v54 = vsel %vm1683_vm15, %v1676_v27, %v1547_v22  ;;  %v1662_v21 = vsel %vm969_vm12, %v1646_v45, %v1511_v30 }
 0x13b   : > { %v795_v18 = vpop.permute.xlu0 %794  ;;  %v831_v7 = vpop.permute.xlu1 %830 }
 0x13c   : > { %v979_v59 = vsel %vm969_vm12, %v962_v55, %v831_v7  ;;  %v947_v14 = vsel %vm935_vm10, %v930_v37, %v795_v18 }
 0x13f   : > { %v1530_v47 = vpop.permute.xlu0 %1529  ;;  %v1566_v33 = vpop.permute.xlu1 %1565 }
 0x140   : > { %v1710_v8 = vsel %vm1700_vm0, %v1693_v54, %v1566_v33  ;;  %v1678_v16 = vsel %vm1003_vm13, %v1662_v21, %v1530_v47 }
 0x143   : > { %v814_v61 = vpop.permute.xlu0 %813  ;;  %v850_v62 = vpop.permute.xlu1 %849 }
 0x144   : > { %v996_v42 = vsel %vm986_vm1, %v979_v59, %v850_v62  ;;  %v964_v50 = vsel %vm952_vm14, %v947_v14, %v814_v61 }
 0x147   : > { %v1549_v39 = vpop.permute.xlu0 %1548  ;;  %v1585_v51 = vpop.permute.xlu1 %1584 }
 0x148   : > { %v1727_v43 = vsel %vm1717_vm3, %v1710_v8, %v1585_v51  ;;  %v1695_v28 = vsel %vm1683_vm15, %v1678_v16, %v1549_v39 }
 0x14b   : > { %v833_v11 = vpop.permute.xlu0 %832  ;;  %v869_v57 = vpop.permute.xlu1 %868 }
 0x14c   : > { %v1013_v46 = vsel %vm1003_vm13, %v996_v42, %v869_v57  ;;  %v981_v12 = vsel %vm969_vm12, %v964_v50, %v833_v11 }
 0x14d   : > { %3222 = vmatprep.mubr.msk.bf16.mxu0 %vm1898_vm4, %v1013_v46 }
 0x14f   : > { %v1568_v5 = vpop.permute.xlu0 %1567  ;;  %v1604_v44 = vpop.permute.xlu1 %1603 }
 0x150   : > { %v1744_v24 = vsel %vm1734_vm6, %v1727_v43, %v1604_v44  ;;  %v1712_v63 = vsel %vm1700_vm0, %v1695_v28, %v1568_v5 }
 0x151   : > { %3202 = vmatprep.mubr.msk.bf16.mxu1 %vm1771_vm7, %v1744_v24 }
 0x153   : > { %v852_v38 = vpop.permute.xlu0 %851  ;;  %v871_v31 = vpop.permute.xlu1 %870 }
 0x154   : > { %v998_v6 = vsel %vm986_vm1, %v981_v12, %v852_v38 }
 0x155   : > { %v1015_v10 = vsel %vm1003_vm13, %v998_v6, %v871_v31 }
 0x156   : > { %3223 = vmatmul.mubr.msk.bf16.gmra.mrb[8].mxu0 %vm1898_vm4, %v1015_v10 }
 0x157   : > { %v1587_v48 = vpop.permute.xlu0 %1586  ;;  %v1606_v41 = vpop.permute.xlu1 %1605 }
 0x158   : > { %v1729_v40 = vsel %vm1717_vm3, %v1712_v63, %v1587_v48 }
 0x159   : > { %v1746_v9 = vsel %vm1734_vm6, %v1729_v40, %v1606_v41 }
 0x15a   : > { %3203 = vmatmul.mubr.msk.bf16.gmra.mrb[8].mxu1 %vm1771_vm7, %v1746_v9 }
 0x15b   : > { %v719_v0 = vpop.permute.xlu0 %718  ;;  %v759_v15 = vpop.permute.xlu1 %758 }
 0x15c   : > { %v897_v51 = vsel %vm876_vm8, %v4090_v17, %v719_v0 }
 0x15d   : > { %v915_v4 = vsel %vm901_vm9, %v897_v51, %v759_v15 }
 0x15f   : > { %v1454_v2 = vpop.permute.xlu0 %1453  ;;  %v1494_v13 = vpop.permute.xlu1 %1493 }
 0x160   : > { %v1631_v32 = vsel %vm901_vm9, %v4103_v58, %v1454_v2 }
 0x161   : > { %v1648_v11 = vsel %vm935_vm10, %v1631_v32, %v1494_v13 }
 0x163   : > { %v721_v20 = vpop.permute.xlu0 %720  ;;  %v778_v25 = vpop.permute.xlu1 %777 }
 0x164   : > { %v932_v35 = vsel %vm918_vm11, %v915_v4, %v778_v25  ;;  %v900_v45 = vsel %vm876_vm8, %v4177_v53, %v721_v20  ;;  %v4640_v25 = vld [vmem:[%s4936_s4] ss:$0 sm:$0xff]  ;;  %vm2761_vm8 = vcmask 1041409  }
 0x167   : > { %v1456_v26 = vpop.permute.xlu0 %1455  ;;  %v1513_v34 = vpop.permute.xlu1 %1512 }
 0x168   : > { %v1664_v27 = vsel %vm969_vm12, %v1648_v11, %v1513_v34  ;;  %v1634_v24 = vsel %vm901_vm9, %v4259_v19, %v1456_v26 }
 0x16b   : > { %v761_v29 = vpop.permute.xlu0 %760  ;;  %v797_v23 = vpop.permute.xlu1 %796 }
 0x16c   : > { %v949_v59 = vsel %vm935_vm10, %v932_v35, %v797_v23  ;;  %v917_v38 = vsel %vm901_vm9, %v900_v45, %v761_v29  ;;  %vm2763_vm9 = vcmask 1042434  }
 0x16f   : > { %v1496_v30 = vpop.permute.xlu0 %1495  ;;  %v1532_v22 = vpop.permute.xlu1 %1531 }
 0x170   : > { %v1680_v52 = vsel %vm1003_vm13, %v1664_v27, %v1532_v22  ;;  %v1650_v14 = vsel %vm935_vm10, %v1634_v24, %v1496_v30  ;;  %v3440_v22 = vmov 1983009808  }
 0x173   : > { %v780_v18 = vpop.permute.xlu0 %779  ;;  %v816_v7 = vpop.permute.xlu1 %815 }
 0x174   : > { %v966_v42 = vsel %vm952_vm14, %v949_v59, %v816_v7  ;;  %v934_v6 = vsel %vm918_vm11, %v917_v38, %v780_v18  ;;  %v2210_v18 = vunpack.c.l.s4 %v3440_v22  ;;  %v2212_v7 = vlaneseq }
 0x175   : > { %vm2767_vm11 = vcmask 1044484  }
 0x177   : > { %v1515_v47 = vpop.permute.xlu0 %1514  ;;  %v1551_v33 = vpop.permute.xlu1 %1550 }
 0x178   : > { %v1697_v1 = vsel %vm1683_vm15, %v1680_v52, %v1551_v33  ;;  %v1666_v50 = vsel %vm969_vm12, %v1650_v14, %v1515_v47 }
 0x17b   : > { %v799_v61 = vpop.permute.xlu0 %798  ;;  %v835_v62 = vpop.permute.xlu1 %834 }
 0x17c   : > { %v983_v57 = vsel %vm969_vm12, %v966_v42, %v835_v62  ;;  %v951_v10 = vsel %vm935_vm10, %v934_v6, %v799_v61  ;;  %v4649_v61 = vld [vmem:[%s4936_s4 + $0x1] ss:$0 sm:$0xff]  ;;  %vm2765_vm10 = vcmask 1043459  }
 0x17f   : > { %v1534_v49 = vpop.permute.xlu0 %1533  ;;  %v1570_v36 = vpop.permute.xlu1 %1569 }
 0x180   : > { %v1714_v58 = vsel %vm1700_vm0, %v1697_v1, %v1570_v36  ;;  %v1682_v12 = vsel %vm1003_vm13, %v1666_v50, %v1534_v49 }
 0x183   : > { %v818_v56 = vpop.permute.xlu0 %817  ;;  %v854_v39 = vpop.permute.xlu1 %853 }
 0x184   : > { %v1000_v17 = vsel %vm986_vm1, %v983_v57, %v854_v39  ;;  %v968_v63 = vsel %vm952_vm14, %v951_v10, %v818_v56  ;;  %v4656_v39 = vld [vmem:[%s4936_s4 + $0x2] ss:$0 sm:$0xff]  ;;  %vm2771_vm14 = vcmask 1046534  }
 0x187   : > { %v1553_v55 = vpop.permute.xlu0 %1552  ;;  %v1589_v60 = vpop.permute.xlu1 %1588 }
 0x188   : > { %v1731_v43 = vsel %vm1717_vm3, %v1714_v58, %v1589_v60  ;;  %v1699_v31 = vsel %vm1683_vm15, %v1682_v12, %v1553_v55  ;;  %v2211_v55 = vunpack.c.0.s8 %v2210_v18  ;;  %v2213_v60 = vshrl.u32 %v2212_v7, 7 }
 0x189   : > { %vm2773_vm15 = vcmask 1047559  }
 0x18a   : > { %v4667_v52 = vsub.s32 %v2211_v55, %v2213_v60 }
 0x18b   : > { %v837_v46 = vpop.permute.xlu0 %836  ;;  %v873_v54 = vpop.permute.xlu1 %872 }
 0x18c   : > { %v1017_v8 = vsel %vm1003_vm13, %v1000_v17, %v873_v54  ;;  %v985_v48 = vsel %vm969_vm12, %v968_v63, %v837_v46  ;;  %vm2769_vm12 = vcmask 1045509  }
 0x18d   : > { %3226 = vmatprep.mubr.msk.bf16.mxu0 %vm1898_vm4, %v1017_v8 }
 0x18f   : > { %v1572_v5 = vpop.permute.xlu0 %1571  ;;  %v1608_v44 = vpop.permute.xlu1 %1607 }
 0x190   : > { %v1748_v37 = vsel %vm1734_vm6, %v1731_v43, %v1608_v44  ;;  %v1716_v16 = vsel %vm1700_vm0, %v1699_v31, %v1572_v5 }
 0x191   : > { %3206 = vmatprep.mubr.msk.bf16.mxu1 %vm1771_vm7, %v1748_v37 }
 0x193   : > { %v856_v3 = vpop.permute.xlu0 %855  ;;  %v1610_v21 = vpop.permute.xlu1 %1609 }
 0x194   : > { %v1002_v41 = vsel %vm986_vm1, %v985_v48, %v856_v3 }
 0x197   : > { %v1591_v19 = vpop.permute.xlu0 %1590 }
 0x198   : > { %v1733_v28 = vsel %vm1717_vm3, %v1716_v16, %v1591_v19 }
 0x199   : > { %v1750_v53 = vsel %vm1734_vm6, %v1733_v28, %v1610_v21 }
 0x19a   : > { %3207 = vmatmul.mubr.msk.bf16.gmra.mrb[12].mxu1 %vm1771_vm7, %v1750_v53 }
 0x19b   : > { %v875_v40 = vpop.permute.xlu0 %874 }
 0x19c   : > { %v1019_v9 = vsel %vm1003_vm13, %v1002_v41, %v875_v40 }
 0x19d   : > { %3227 = vmatmul.mubr.msk.bf16.gmra.mrb[12].mxu0 %vm1898_vm4, %v1019_v9 }
 0x1a9   : > { %v3216_v0 = vpop.f32.mrb[0].mxu0 }
 0x1aa   : > { %v1953_v15 = vpop.f32.mrb[1].mxu0 }
 0x1ab   : > { %v3217_v2 = vpop.f32.mrb[2].mxu0 }
 0x1ac   : > { %v1956_v13 = vpop.f32.mrb[3].mxu0 }
 0x1ad   : > { %v3196_v20 = vpop.f32.mrb[0].mxu1 }
 0x1ae   : > { %v1962_v26 = vadd.f32 %v3216_v0, %v3196_v20  ;;  %v1826_v34 = vpop.f32.mrb[1].mxu1 }
 0x1af   : > { %v1954_v29 = vadd.f32 %v1953_v15, %v1826_v34  ;;  %v3197_v23 = vpop.f32.mrb[2].mxu1 }
 0x1b0   : > { %v2023_v30 = vadd.f32 %v4640_v25, %v1962_v26  ;;  %v1965_v47 = vadd.f32 %v3217_v2, %v3197_v23  ;;  %v1829_v33 = vpop.f32.mrb[3].mxu1 }
 0x1b1   : > { %v2021_v62 = vadd.f32 %v4640_v25, %v1954_v29  ;;  %v1957_v49 = vadd.f32 %v1956_v13, %v1829_v33 }
 0x1b2   : > { %v2039_v36 = vmax.f32 %v2023_v30, 0.0  ;;  %v2024_v56 = vadd.f32 %v4640_v25, %v1965_v47 }
 0x1b3   : > { %v2037_v51 = vmax.f32 %v2021_v62, 0.0  ;;  %v2022_v4 = vadd.f32 %v4640_v25, %v1957_v49 }
 0x1b4   : > { %v2060_v35 = vmul.f32 %v4649_v61, %v2039_v36  ;;  %v2040_v59 = vmax.f32 %v2024_v56, 0.0 }
 0x1b5   : > { %v2058_v32 = vmul.f32 %v4649_v61, %v2037_v51  ;;  %v2038_v42 = vmax.f32 %v2022_v4, 0.0 }
 0x1b6   : > { %v2081_v11 = vadd.f32 %v4656_v39, %v2060_v35  ;;  %v2061_v57 = vmul.f32 %v4649_v61, %v2040_v59 }
 0x1b7   : > { %v2079_v27 = vadd.f32 %v4656_v39, %v2058_v32  ;;  %v2059_v17 = vmul.f32 %v4649_v61, %v2038_v42 }
 0x1b8   : > { %v3119_v46 = vpack.c.bf16 %v2081_v11, %v2081_v11  ;;  %v2177_v54 = vsel %vm1003_vm13, %v2081_v11, -inf  ;;  %v2082_v8 = vadd.f32 %v4656_v39, %v2061_v57 }
 0x1b9   : > { %v3117_v1 = vpack.c.bf16 %v2079_v27, %v2079_v27  ;;  %v2176_v58 = vsel %vm1003_vm13, %v2079_v27, -inf  ;;  %v2080_v43 = vadd.f32 %v4656_v39, %v2059_v17 }
 0x1ba   : > { %2162 = vst.msk [vmem:[%s4672_s9 + $0x8] sm:$0xf] %vm2159_vm2, %v3119_v46  ;;  %v2178_v5 = vmax.f32 %v2176_v58, %v2177_v54  ;;  %v3120_v44 = vpack.c.bf16 %v2082_v8, %v2082_v8  ;;  %v2180_v37 = vsel %vm1003_vm13, %v2082_v8, -inf }
 0x1bb   : > { %2160 = vst.msk [vmem:[%s4672_s9] sm:$0xf] %vm2159_vm2, %v3117_v1  ;;  %v3118_v24 = vpack.c.bf16 %v2080_v43, %v2080_v43  ;;  %v2179_v14 = vsel %vm1003_vm13, %v2080_v43, -inf }
 0x1bc   : > { %v2208_v3 = vcombine.high %v2178_v5, %v2178_v5  ;;  %v2215_v50 = vrot.slane %v2178_v5, %v4667_v52  ;;  %2163 = vst.msk [vmem:[%s4672_s9 + $0xc] sm:$0xf] %vm2159_vm2, %v3120_v44  ;;  %v2181_v45 = vmax.f32 %v2179_v14, %v2180_v37 }
 0x1bd   : > { %2161 = vst.msk [vmem:[%s4672_s9 + $0x4] sm:$0xf] %vm2159_vm2, %v3118_v24 }
 0x1be   : > { %v2222_v12 = vrot.slane %v2208_v3, %v4667_v52  ;;  %v2223_v38 = vcombine.high %v2215_v50, %v2215_v50  ;;  %v2377_v31 = vsel %vm2376_vm5, %v2215_v50, -inf  ;;  %v2225_v21 = vcombine.high %v2181_v45, %v2181_v45 }
 0x1bf   : > { %v2378_v6 = vrot.slane %v2377_v31, 4  ;;  %v2232_v16 = vrot.slane %v2181_v45, %v4667_v52 }
 0x1c0   : > { %v2224_v19 = vcombine.high %v2222_v12, %v2222_v12  ;;  %v2384_v10 = vsel %vm2376_vm5, %v2223_v38, -inf  ;;  %v2391_v28 = vsel %vm2376_vm5, %v2222_v12, -inf  ;;  %v2239_v63 = vrot.slane %v2225_v21, %v4667_v52 }
 0x1c1   : > { %v2379_v53 = vmax.f32 %v2377_v31, %v2378_v6  ;;  %v2385_v48 = vrot.slane %v2384_v10, 4  ;;  %v2392_v41 = vrot.slane %v2391_v28, 4  ;;  %v2240_v40 = vcombine.high %v2232_v16, %v2232_v16 }
 0x1c2   : > { %v2398_v9 = vsel %vm2376_vm5, %v2224_v19, -inf  ;;  %v2241_v0 = vcombine.high %v2239_v63, %v2239_v63  ;;  %v2405_v15 = vsel %vm2376_vm5, %v2232_v16, -inf  ;;  %v2419_v2 = vsel %vm2376_vm5, %v2239_v63, -inf }
 0x1c3   : > { %v2380_v13 = vrot.slane %v2379_v53, 2  ;;  %v2386_v20 = vmax.f32 %v2384_v10, %v2385_v48  ;;  %v2393_v26 = vmax.f32 %v2391_v28, %v2392_v41  ;;  %v2399_v34 = vrot.slane %v2398_v9, 4 }
 0x1c4   : > { %v2406_v29 = vrot.slane %v2405_v15, 4  ;;  %v2412_v23 = vsel %vm2376_vm5, %v2240_v40, -inf  ;;  %v2420_v30 = vrot.slane %v2419_v2, 4  ;;  %v2426_v22 = vsel %vm2376_vm5, %v2241_v0, -inf }
 0x1c5   : > { %v2381_v18 = vmax.f32 %v2379_v53, %v2380_v13  ;;  %v2387_v7 = vrot.slane %v2386_v20, 2  ;;  %v2394_v47 = vrot.slane %v2393_v26, 2  ;;  %v2400_v33 = vmax.f32 %v2398_v9, %v2399_v34 }
 0x1c6   : > { %v2407_v62 = vmax.f32 %v2405_v15, %v2406_v29  ;;  %v2413_v49 = vrot.slane %v2412_v23, 4  ;;  %v2421_v36 = vmax.f32 %v2419_v2, %v2420_v30  ;;  %v2427_v56 = vrot.slane %v2426_v22, 4 }
 0x1c7   : > { %v2382_v51 = vrot.slane %v2381_v18, 1  ;;  %v2388_v4 = vmax.f32 %v2386_v20, %v2387_v7  ;;  %v2395_v35 = vmax.f32 %v2393_v26, %v2394_v47  ;;  %v2401_v55 = vrot.slane %v2400_v33, 2 }
 0x1c8   : > { %v2408_v60 = vrot.slane %v2407_v62, 2  ;;  %v2414_v59 = vmax.f32 %v2412_v23, %v2413_v49  ;;  %v2422_v32 = vrot.slane %v2421_v36, 2  ;;  %v2428_v42 = vmax.f32 %v2426_v22, %v2427_v56 }
 0x1c9   : > { %v2383_v11 = vmax.f32 %v2381_v18, %v2382_v51  ;;  %v2389_v57 = vrot.slane %v2388_v4, 1  ;;  %v2396_v27 = vrot.slane %v2395_v35, 1  ;;  %v2402_v17 = vmax.f32 %v2400_v33, %v2401_v55 }
 0x1ca   : > { %v2409_v46 = vmax.f32 %v2407_v62, %v2408_v60  ;;  %v2415_v54 = vrot.slane %v2414_v59, 2  ;;  %v2423_v8 = vmax.f32 %v2421_v36, %v2422_v32  ;;  %v2429_v1 = vrot.slane %v2428_v42, 2 }
 0x1cb   : > { %v2390_v58 = vmax.f32 %v2388_v4, %v2389_v57  ;;  %v2397_v43 = vmax.f32 %v2395_v35, %v2396_v27  ;;  %v2403_v5 = vrot.slane %v2402_v17, 1  ;;  %v3133_v44 = vpack.c.bf16 %v2383_v11, %v2383_v11 }
 0x1cc   : > { %v2410_v37 = vrot.slane %v2409_v46, 1  ;;  %v2416_v24 = vmax.f32 %v2414_v59, %v2415_v54  ;;  %v2424_v14 = vrot.slane %v2423_v8, 1  ;;  %v2430_v3 = vmax.f32 %v2428_v42, %v2429_v1 }
 0x1cd   : > { %v2404_v50 = vmax.f32 %v2402_v17, %v2403_v5  ;;  %v3134_v45 = vpack.c.bf16 %v2390_v58, %v2390_v58  ;;  %v3135_v12 = vpack.c.bf16 %v2397_v43, %v2397_v43  ;;  %v2729_v19 = vunpack.c.l.b16 %v3133_v44 }
 0x1ce   : > { %v2411_v38 = vmax.f32 %v2409_v46, %v2410_v37  ;;  %v2417_v31 = vrot.slane %v2416_v24, 1  ;;  %v2425_v21 = vmax.f32 %v2423_v8, %v2424_v14  ;;  %v2431_v6 = vrot.slane %v2430_v3, 1 }
 0x1cf   : > { %v3136_v16 = vpack.c.bf16 %v2404_v50, %v2404_v50  ;;  %v2730_v10 = vunpack.c.l.b16 %v3134_v45  ;;  %v2731_v28 = vunpack.c.l.b16 %v3135_v12 }
 0x1d0   : > { %v2418_v63 = vmax.f32 %v2416_v24, %v2417_v31  ;;  %v2432_v53 = vmax.f32 %v2430_v3, %v2431_v6  ;;  %v3137_v48 = vpack.c.bf16 %v2411_v38, %v2411_v38  ;;  %v3139_v9 = vpack.c.bf16 %v2425_v21, %v2425_v21 }
 0x1d1   : > { %v2732_v41 = vunpack.c.l.b16 %v3136_v16  ;;  %v2762_v40 = vsel %vm2761_vm8, %v2730_v10, %v2729_v19 }
 0x1d2   : > { %v2764_v0 = vsel %vm2763_vm9, %v2731_v28, %v2762_v40  ;;  %v3138_v15 = vpack.c.bf16 %v2418_v63, %v2418_v63  ;;  %v3140_v2 = vpack.c.bf16 %v2432_v53, %v2432_v53  ;;  %v2733_v13 = vunpack.c.l.b16 %v3137_v48 }
 0x1d3   : > { %v2766_v20 = vsel %vm2765_vm10, %v2732_v41, %v2764_v0  ;;  %v2735_v29 = vunpack.c.l.b16 %v3139_v9 }
 0x1d4   : > { %v2734_v26 = vunpack.c.l.b16 %v3138_v15  ;;  %v2768_v34 = vsel %vm2767_vm11, %v2733_v13, %v2766_v20  ;;  %v2736_v23 = vunpack.c.l.b16 %v3140_v2 }
 0x1d6   : > { %v2770_v30 = vsel %vm2769_vm12, %v2734_v26, %v2768_v34 }
 0x1d7   : > { %v2772_v22 = vsel %vm2771_vm14, %v2735_v29, %v2770_v30 }
 0x1d8   : > { %v2774_v18 = vsel %vm2773_vm15, %v2736_v23, %v2772_v22 }
 0x1d9   : > { %v2796_v7 = vpack.c.b16 %v2774_v18, %v2774_v18 }
 0x1db   : > { %2804 = vst.msk [vmem:[%s4704_s14] sm:$0xf] %vm2159_vm2, %v2796_v7 }
 0x1e9   : > { %v3220_v47 = vpop.f32.mrb[4].mxu0 }
 0x1ea   : > { %v1969_v33 = vpop.f32.mrb[5].mxu0 }
 0x1eb   : > { %v3221_v62 = vpop.f32.mrb[6].mxu0 }
 0x1ec   : > { %v1972_v49 = vpop.f32.mrb[7].mxu0 }
 0x1ed   : > { %v3200_v36 = vpop.f32.mrb[4].mxu1 }
 0x1ee   : > { %v1978_v56 = vadd.f32 %v3220_v47, %v3200_v36  ;;  %v1842_v51 = vpop.f32.mrb[5].mxu1 }
 0x1ef   : > { %v1970_v4 = vadd.f32 %v1969_v33, %v1842_v51  ;;  %v3201_v35 = vpop.f32.mrb[6].mxu1 }
 0x1f0   : > { %v2027_v55 = vadd.f32 %v4640_v25, %v1978_v56  ;;  %v1981_v60 = vadd.f32 %v3221_v62, %v3201_v35  ;;  %v1845_v59 = vpop.f32.mrb[7].mxu1 }
 0x1f1   : > { %v2025_v32 = vadd.f32 %v4640_v25, %v1970_v4  ;;  %v1973_v42 = vadd.f32 %v1972_v49, %v1845_v59 }
 0x1f2   : > { %v2043_v11 = vmax.f32 %v2027_v55, 0.0  ;;  %v2028_v57 = vadd.f32 %v4640_v25, %v1981_v60 }
 0x1f3   : > { %v2041_v27 = vmax.f32 %v2025_v32, 0.0  ;;  %v2026_v17 = vadd.f32 %v4640_v25, %v1973_v42 }
 0x1f4   : > { %v2064_v46 = vmul.f32 %v4649_v61, %v2043_v11  ;;  %v2044_v54 = vmax.f32 %v2028_v57, 0.0 }
 0x1f5   : > { %v2062_v8 = vmul.f32 %v4649_v61, %v2041_v27  ;;  %v2042_v1 = vmax.f32 %v2026_v17, 0.0 }
 0x1f6   : > { %v2085_v58 = vadd.f32 %v4656_v39, %v2064_v46  ;;  %v2065_v43 = vmul.f32 %v4649_v61, %v2044_v54 }
 0x1f7   : > { %v2083_v5 = vadd.f32 %v4656_v39, %v2062_v8  ;;  %v2063_v44 = vmul.f32 %v4649_v61, %v2042_v1 }
 0x1f8   : > { %v3123_v37 = vpack.c.bf16 %v2085_v58, %v2085_v58  ;;  %v2183_v24 = vsel %vm1003_vm13, %v2085_v58, -inf  ;;  %v2086_v14 = vadd.f32 %v4656_v39, %v2065_v43 }
 0x1f9   : > { %v3121_v3 = vpack.c.bf16 %v2083_v5, %v2083_v5  ;;  %v2182_v50 = vsel %vm1003_vm13, %v2083_v5, -inf  ;;  %v2084_v45 = vadd.f32 %v4656_v39, %v2063_v44 }
 0x1fa   : > { %2166 = vst.msk [vmem:[%s4672_s9 + $0x18] sm:$0xf] %vm2159_vm2, %v3123_v37  ;;  %v2184_v12 = vmax.f32 %v2182_v50, %v2183_v24  ;;  %v3124_v38 = vpack.c.bf16 %v2086_v14, %v2086_v14  ;;  %v2186_v31 = vsel %vm1003_vm13, %v2086_v14, -inf }
 0x1fb   : > { %2164 = vst.msk [vmem:[%s4672_s9 + $0x10] sm:$0xf] %vm2159_vm2, %v3121_v3  ;;  %v3122_v21 = vpack.c.bf16 %v2084_v45, %v2084_v45  ;;  %v2185_v6 = vsel %vm1003_vm13, %v2084_v45, -inf }
 0x1fc   : > { %v2242_v16 = vcombine.high %v2184_v12, %v2184_v12  ;;  %v2249_v19 = vrot.slane %v2184_v12, %v4667_v52  ;;  %2167 = vst.msk [vmem:[%s4672_s9 + $0x1c] sm:$0xf] %vm2159_vm2, %v3124_v38  ;;  %v2187_v10 = vmax.f32 %v2185_v6, %v2186_v31 }
 0x1fd   : > { %2165 = vst.msk [vmem:[%s4672_s9 + $0x14] sm:$0xf] %vm2159_vm2, %v3122_v21 }
 0x1fe   : > { %v2256_v28 = vrot.slane %v2242_v16, %v4667_v52  ;;  %v2257_v63 = vcombine.high %v2249_v19, %v2249_v19  ;;  %v2433_v53 = vsel %vm2376_vm5, %v2249_v19, -inf  ;;  %v2259_v48 = vcombine.high %v2187_v10, %v2187_v10 }
 0x1ff   : > { %v2434_v41 = vrot.slane %v2433_v53, 4  ;;  %v2266_v40 = vrot.slane %v2187_v10, %v4667_v52 }
 0x200   : > { %v2258_v9 = vcombine.high %v2256_v28, %v2256_v28  ;;  %v2440_v0 = vsel %vm2376_vm5, %v2257_v63, -inf  ;;  %v2447_v15 = vsel %vm2376_vm5, %v2256_v28, -inf  ;;  %v2273_v2 = vrot.slane %v2259_v48, %v4667_v52 }
 0x201   : > { %v2435_v13 = vmax.f32 %v2433_v53, %v2434_v41  ;;  %v2441_v20 = vrot.slane %v2440_v0, 4  ;;  %v2448_v26 = vrot.slane %v2447_v15, 4  ;;  %v2274_v34 = vcombine.high %v2266_v40, %v2266_v40 }
 0x202   : > { %v2454_v29 = vsel %vm2376_vm5, %v2258_v9, -inf  ;;  %v2275_v23 = vcombine.high %v2273_v2, %v2273_v2  ;;  %v2461_v30 = vsel %vm2376_vm5, %v2266_v40, -inf  ;;  %v2475_v22 = vsel %vm2376_vm5, %v2273_v2, -inf }
 0x203   : > { %v2436_v18 = vrot.slane %v2435_v13, 2  ;;  %v2442_v7 = vmax.f32 %v2440_v0, %v2441_v20  ;;  %v2449_v47 = vmax.f32 %v2447_v15, %v2448_v26  ;;  %v2455_v33 = vrot.slane %v2454_v29, 4 }
 0x204   : > { %v2462_v62 = vrot.slane %v2461_v30, 4  ;;  %v2468_v49 = vsel %vm2376_vm5, %v2274_v34, -inf  ;;  %v2476_v36 = vrot.slane %v2475_v22, 4  ;;  %v2482_v56 = vsel %vm2376_vm5, %v2275_v23, -inf }
 0x205   : > { %v2437_v51 = vmax.f32 %v2435_v13, %v2436_v18  ;;  %v2443_v4 = vrot.slane %v2442_v7, 2  ;;  %v2450_v35 = vrot.slane %v2449_v47, 2  ;;  %v2456_v55 = vmax.f32 %v2454_v29, %v2455_v33 }
 0x206   : > { %v2463_v60 = vmax.f32 %v2461_v30, %v2462_v62  ;;  %v2469_v59 = vrot.slane %v2468_v49, 4  ;;  %v2477_v32 = vmax.f32 %v2475_v22, %v2476_v36  ;;  %v2483_v42 = vrot.slane %v2482_v56, 4 }
 0x207   : > { %v2438_v11 = vrot.slane %v2437_v51, 1  ;;  %v2444_v57 = vmax.f32 %v2442_v7, %v2443_v4  ;;  %v2451_v27 = vmax.f32 %v2449_v47, %v2450_v35  ;;  %v2457_v17 = vrot.slane %v2456_v55, 2 }
 0x208   : > { %v2464_v46 = vrot.slane %v2463_v60, 2  ;;  %v2470_v54 = vmax.f32 %v2468_v49, %v2469_v59  ;;  %v2478_v8 = vrot.slane %v2477_v32, 2  ;;  %v2484_v1 = vmax.f32 %v2482_v56, %v2483_v42 }
 0x209   : > { %v2439_v58 = vmax.f32 %v2437_v51, %v2438_v11  ;;  %v2445_v43 = vrot.slane %v2444_v57, 1  ;;  %v2452_v5 = vrot.slane %v2451_v27, 1  ;;  %v2458_v44 = vmax.f32 %v2456_v55, %v2457_v17 }
 0x20a   : > { %v2465_v37 = vmax.f32 %v2463_v60, %v2464_v46  ;;  %v2471_v24 = vrot.slane %v2470_v54, 2  ;;  %v2479_v14 = vmax.f32 %v2477_v32, %v2478_v8  ;;  %v2485_v3 = vrot.slane %v2484_v1, 2 }
 0x20b   : > { %v2446_v50 = vmax.f32 %v2444_v57, %v2445_v43  ;;  %v2453_v45 = vmax.f32 %v2451_v27, %v2452_v5  ;;  %v2459_v12 = vrot.slane %v2458_v44, 1  ;;  %v3141_v38 = vpack.c.bf16 %v2439_v58, %v2439_v58 }
 0x20c   : > { %v2466_v31 = vrot.slane %v2465_v37, 1  ;;  %v2472_v21 = vmax.f32 %v2470_v54, %v2471_v24  ;;  %v2480_v6 = vrot.slane %v2479_v14, 1  ;;  %v2486_v16 = vmax.f32 %v2484_v1, %v2485_v3 }
 0x20d   : > { %v2460_v19 = vmax.f32 %v2458_v44, %v2459_v12  ;;  %v3142_v10 = vpack.c.bf16 %v2446_v50, %v2446_v50  ;;  %v3143_v28 = vpack.c.bf16 %v2453_v45, %v2453_v45  ;;  %v2737_v9 = vunpack.c.l.b16 %v3141_v38 }
 0x20e   : > { %v2467_v63 = vmax.f32 %v2465_v37, %v2466_v31  ;;  %v2473_v53 = vrot.slane %v2472_v21, 1  ;;  %v2481_v48 = vmax.f32 %v2479_v14, %v2480_v6  ;;  %v2487_v41 = vrot.slane %v2486_v16, 1 }
 0x20f   : > { %v3144_v40 = vpack.c.bf16 %v2460_v19, %v2460_v19  ;;  %v2738_v0 = vunpack.c.l.b16 %v3142_v10  ;;  %v2739_v15 = vunpack.c.l.b16 %v3143_v28 }
 0x210   : > { %v2474_v2 = vmax.f32 %v2472_v21, %v2473_v53  ;;  %v2488_v13 = vmax.f32 %v2486_v16, %v2487_v41  ;;  %v3145_v20 = vpack.c.bf16 %v2467_v63, %v2467_v63  ;;  %v3147_v29 = vpack.c.bf16 %v2481_v48, %v2481_v48 }
 0x211   : > { %v2740_v26 = vunpack.c.l.b16 %v3144_v40  ;;  %v2775_v34 = vsel %vm2761_vm8, %v2738_v0, %v2737_v9 }
 0x212   : > { %v2776_v23 = vsel %vm2763_vm9, %v2739_v15, %v2775_v34  ;;  %v3146_v30 = vpack.c.bf16 %v2474_v2, %v2474_v2  ;;  %v3148_v22 = vpack.c.bf16 %v2488_v13, %v2488_v13  ;;  %v2741_v18 = vunpack.c.l.b16 %v3145_v20 }
 0x213   : > { %v2777_v7 = vsel %vm2765_vm10, %v2740_v26, %v2776_v23  ;;  %v2743_v62 = vunpack.c.l.b16 %v3147_v29 }
 0x214   : > { %v2742_v47 = vunpack.c.l.b16 %v3146_v30  ;;  %v2778_v33 = vsel %vm2767_vm11, %v2741_v18, %v2777_v7  ;;  %v2744_v49 = vunpack.c.l.b16 %v3148_v22 }
 0x216   : > { %v2779_v36 = vsel %vm2769_vm12, %v2742_v47, %v2778_v33 }
 0x217   : > { %v2780_v56 = vsel %vm2771_vm14, %v2743_v62, %v2779_v36 }
 0x218   : > { %v2781_v51 = vsel %vm2773_vm15, %v2744_v49, %v2780_v56 }
 0x219   : > { %v2797_v4 = vpack.c.b16 %v2781_v51, %v2781_v51 }
 0x21b   : > { %2805 = vst.msk [vmem:[%s4704_s14 + $0x4] sm:$0xf] %vm2159_vm2, %v2797_v4 }
 0x229   : > { %v3224_v35 = vpop.f32.mrb[8].mxu0 }
 0x22a   : > { %v1985_v55 = vpop.f32.mrb[9].mxu0 }
 0x22b   : > { %v3225_v60 = vpop.f32.mrb[10].mxu0 }
 0x22c   : > { %v1988_v59 = vpop.f32.mrb[11].mxu0 }
 0x22d   : > { %v3204_v32 = vpop.f32.mrb[8].mxu1 }
 0x22e   : > { %v1994_v42 = vadd.f32 %v3224_v35, %v3204_v32  ;;  %v1858_v11 = vpop.f32.mrb[9].mxu1 }
 0x22f   : > { %v1986_v57 = vadd.f32 %v1985_v55, %v1858_v11  ;;  %v3205_v27 = vpop.f32.mrb[10].mxu1 }
 0x230   : > { %v2031_v17 = vadd.f32 %v4640_v25, %v1994_v42  ;;  %v1997_v46 = vadd.f32 %v3225_v60, %v3205_v27  ;;  %v1861_v54 = vpop.f32.mrb[11].mxu1 }
 0x231   : > { %v2029_v8 = vadd.f32 %v4640_v25, %v1986_v57  ;;  %v1989_v1 = vadd.f32 %v1988_v59, %v1861_v54 }
 0x232   : > { %v2047_v58 = vmax.f32 %v2031_v17, 0.0  ;;  %v2032_v43 = vadd.f32 %v4640_v25, %v1997_v46 }
 0x233   : > { %v2045_v5 = vmax.f32 %v2029_v8, 0.0  ;;  %v2030_v44 = vadd.f32 %v4640_v25, %v1989_v1 }
 0x234   : > { %v2068_v37 = vmul.f32 %v4649_v61, %v2047_v58  ;;  %v2048_v24 = vmax.f32 %v2032_v43, 0.0 }
 0x235   : > { %v2066_v14 = vmul.f32 %v4649_v61, %v2045_v5  ;;  %v2046_v3 = vmax.f32 %v2030_v44, 0.0 }
 0x236   : > { %v2089_v50 = vadd.f32 %v4656_v39, %v2068_v37  ;;  %v2069_v45 = vmul.f32 %v4649_v61, %v2048_v24 }
 0x237   : > { %v2087_v12 = vadd.f32 %v4656_v39, %v2066_v14  ;;  %v2067_v38 = vmul.f32 %v4649_v61, %v2046_v3 }
 0x238   : > { %v3127_v31 = vpack.c.bf16 %v2089_v50, %v2089_v50  ;;  %v2189_v21 = vsel %vm1003_vm13, %v2089_v50, -inf  ;;  %v2090_v6 = vadd.f32 %v4656_v39, %v2069_v45 }
 0x239   : > { %v3125_v16 = vpack.c.bf16 %v2087_v12, %v2087_v12  ;;  %v2188_v19 = vsel %vm1003_vm13, %v2087_v12, -inf  ;;  %v2088_v10 = vadd.f32 %v4656_v39, %v2067_v38 }
 0x23a   : > { %2170 = vst.msk [vmem:[%s4672_s9 + $0x28] sm:$0xf] %vm2159_vm2, %v3127_v31  ;;  %v2190_v28 = vmax.f32 %v2188_v19, %v2189_v21  ;;  %v3128_v63 = vpack.c.bf16 %v2090_v6, %v2090_v6  ;;  %v2192_v53 = vsel %vm1003_vm13, %v2090_v6, -inf }
 0x23b   : > { %2168 = vst.msk [vmem:[%s4672_s9 + $0x20] sm:$0xf] %vm2159_vm2, %v3125_v16  ;;  %v3126_v48 = vpack.c.bf16 %v2088_v10, %v2088_v10  ;;  %v2191_v41 = vsel %vm1003_vm13, %v2088_v10, -inf }
 0x23c   : > { %v2276_v40 = vcombine.high %v2190_v28, %v2190_v28  ;;  %v2283_v9 = vrot.slane %v2190_v28, %v4667_v52  ;;  %2171 = vst.msk [vmem:[%s4672_s9 + $0x2c] sm:$0xf] %vm2159_vm2, %v3128_v63  ;;  %v2193_v0 = vmax.f32 %v2191_v41, %v2192_v53 }
 0x23d   : > { %2169 = vst.msk [vmem:[%s4672_s9 + $0x24] sm:$0xf] %vm2159_vm2, %v3126_v48 }
 0x23e   : > { %v2290_v15 = vrot.slane %v2276_v40, %v4667_v52  ;;  %v2291_v2 = vcombine.high %v2283_v9, %v2283_v9  ;;  %v2489_v13 = vsel %vm2376_vm5, %v2283_v9, -inf  ;;  %v2293_v20 = vcombine.high %v2193_v0, %v2193_v0 }
 0x23f   : > { %v2490_v26 = vrot.slane %v2489_v13, 4  ;;  %v2300_v34 = vrot.slane %v2193_v0, %v4667_v52 }
 0x240   : > { %v2292_v29 = vcombine.high %v2290_v15, %v2290_v15  ;;  %v2496_v23 = vsel %vm2376_vm5, %v2291_v2, -inf  ;;  %v2503_v30 = vsel %vm2376_vm5, %v2290_v15, -inf  ;;  %v2307_v22 = vrot.slane %v2293_v20, %v4667_v52 }
 0x241   : > { %v2491_v18 = vmax.f32 %v2489_v13, %v2490_v26  ;;  %v2497_v7 = vrot.slane %v2496_v23, 4  ;;  %v2504_v47 = vrot.slane %v2503_v30, 4  ;;  %v2308_v33 = vcombine.high %v2300_v34, %v2300_v34 }
 0x242   : > { %v2510_v62 = vsel %vm2376_vm5, %v2292_v29, -inf  ;;  %v2309_v49 = vcombine.high %v2307_v22, %v2307_v22  ;;  %v2517_v36 = vsel %vm2376_vm5, %v2300_v34, -inf  ;;  %v2531_v56 = vsel %vm2376_vm5, %v2307_v22, -inf }
 0x243   : > { %v2492_v51 = vrot.slane %v2491_v18, 2  ;;  %v2498_v4 = vmax.f32 %v2496_v23, %v2497_v7  ;;  %v2505_v35 = vmax.f32 %v2503_v30, %v2504_v47  ;;  %v2511_v55 = vrot.slane %v2510_v62, 4 }
 0x244   : > { %v2518_v60 = vrot.slane %v2517_v36, 4  ;;  %v2524_v59 = vsel %vm2376_vm5, %v2308_v33, -inf  ;;  %v2532_v32 = vrot.slane %v2531_v56, 4  ;;  %v2538_v42 = vsel %vm2376_vm5, %v2309_v49, -inf }
 0x245   : > { %v2493_v11 = vmax.f32 %v2491_v18, %v2492_v51  ;;  %v2499_v57 = vrot.slane %v2498_v4, 2  ;;  %v2506_v27 = vrot.slane %v2505_v35, 2  ;;  %v2512_v17 = vmax.f32 %v2510_v62, %v2511_v55 }
 0x246   : > { %v2519_v46 = vmax.f32 %v2517_v36, %v2518_v60  ;;  %v2525_v54 = vrot.slane %v2524_v59, 4  ;;  %v2533_v8 = vmax.f32 %v2531_v56, %v2532_v32  ;;  %v2539_v1 = vrot.slane %v2538_v42, 4 }
 0x247   : > { %v2494_v58 = vrot.slane %v2493_v11, 1  ;;  %v2500_v43 = vmax.f32 %v2498_v4, %v2499_v57  ;;  %v2507_v5 = vmax.f32 %v2505_v35, %v2506_v27  ;;  %v2513_v44 = vrot.slane %v2512_v17, 2 }
 0x248   : > { %v2520_v37 = vrot.slane %v2519_v46, 2  ;;  %v2526_v24 = vmax.f32 %v2524_v59, %v2525_v54  ;;  %v2534_v14 = vrot.slane %v2533_v8, 2  ;;  %v2540_v3 = vmax.f32 %v2538_v42, %v2539_v1 }
 0x249   : > { %v2495_v50 = vmax.f32 %v2493_v11, %v2494_v58  ;;  %v2501_v45 = vrot.slane %v2500_v43, 1  ;;  %v2508_v12 = vrot.slane %v2507_v5, 1  ;;  %v2514_v38 = vmax.f32 %v2512_v17, %v2513_v44 }
 0x24a   : > { %v2521_v31 = vmax.f32 %v2519_v46, %v2520_v37  ;;  %v2527_v21 = vrot.slane %v2526_v24, 2  ;;  %v2535_v6 = vmax.f32 %v2533_v8, %v2534_v14  ;;  %v2541_v16 = vrot.slane %v2540_v3, 2 }
 0x24b   : > { %v2502_v19 = vmax.f32 %v2500_v43, %v2501_v45  ;;  %v2509_v10 = vmax.f32 %v2507_v5, %v2508_v12  ;;  %v2515_v28 = vrot.slane %v2514_v38, 1  ;;  %v3149_v63 = vpack.c.bf16 %v2495_v50, %v2495_v50 }
 0x24c   : > { %v2522_v53 = vrot.slane %v2521_v31, 1  ;;  %v2528_v48 = vmax.f32 %v2526_v24, %v2527_v21  ;;  %v2536_v41 = vrot.slane %v2535_v6, 1  ;;  %v2542_v40 = vmax.f32 %v2540_v3, %v2541_v16 }
 0x24d   : > { %v2516_v9 = vmax.f32 %v2514_v38, %v2515_v28  ;;  %v3150_v0 = vpack.c.bf16 %v2502_v19, %v2502_v19  ;;  %v3151_v15 = vpack.c.bf16 %v2509_v10, %v2509_v10  ;;  %v2745_v29 = vunpack.c.l.b16 %v3149_v63 }
 0x24e   : > { %v2523_v2 = vmax.f32 %v2521_v31, %v2522_v53  ;;  %v2529_v13 = vrot.slane %v2528_v48, 1  ;;  %v2537_v20 = vmax.f32 %v2535_v6, %v2536_v41  ;;  %v2543_v26 = vrot.slane %v2542_v40, 1 }
 0x24f   : > { %v3152_v34 = vpack.c.bf16 %v2516_v9, %v2516_v9  ;;  %v2746_v23 = vunpack.c.l.b16 %v3150_v0  ;;  %v2747_v30 = vunpack.c.l.b16 %v3151_v15 }
 0x250   : > { %v2530_v22 = vmax.f32 %v2528_v48, %v2529_v13  ;;  %v2544_v18 = vmax.f32 %v2542_v40, %v2543_v26  ;;  %v3153_v7 = vpack.c.bf16 %v2523_v2, %v2523_v2  ;;  %v3155_v62 = vpack.c.bf16 %v2537_v20, %v2537_v20 }
 0x251   : > { %v2748_v47 = vunpack.c.l.b16 %v3152_v34  ;;  %v2782_v33 = vsel %vm2761_vm8, %v2746_v23, %v2745_v29 }
 0x252   : > { %v2783_v49 = vsel %vm2763_vm9, %v2747_v30, %v2782_v33  ;;  %v3154_v36 = vpack.c.bf16 %v2530_v22, %v2530_v22  ;;  %v3156_v56 = vpack.c.bf16 %v2544_v18, %v2544_v18  ;;  %v2749_v51 = vunpack.c.l.b16 %v3153_v7 }
 0x253   : > { %v2784_v4 = vsel %vm2765_vm10, %v2748_v47, %v2783_v49  ;;  %v2751_v60 = vunpack.c.l.b16 %v3155_v62 }
 0x254   : > { %v2750_v35 = vunpack.c.l.b16 %v3154_v36  ;;  %v2785_v55 = vsel %vm2767_vm11, %v2749_v51, %v2784_v4  ;;  %v2752_v59 = vunpack.c.l.b16 %v3156_v56 }
 0x256   : > { %v2786_v32 = vsel %vm2769_vm12, %v2750_v35, %v2785_v55 }
 0x257   : > { %v2787_v42 = vsel %vm2771_vm14, %v2751_v60, %v2786_v32 }
 0x258   : > { %v2788_v11 = vsel %vm2773_vm15, %v2752_v59, %v2787_v42 }
 0x259   : > { %v2798_v57 = vpack.c.b16 %v2788_v11, %v2788_v11 }
 0x25b   : > { %2806 = vst.msk [vmem:[%s4704_s14 + $0x8] sm:$0xf] %vm2159_vm2, %v2798_v57 }
 0x26d   : > { %v3208_v27 = vpop.f32.mrb[12].mxu1 }
 0x26e   : > { %v1874_v17 = vpop.f32.mrb[13].mxu1 }
 0x26f   : > { %v3209_v46 = vpop.f32.mrb[14].mxu1 }
 0x270   : > { %v1877_v54 = vpop.f32.mrb[15].mxu1  ;;  %v3228_v8 = vpop.f32.mrb[12].mxu0 }
 0x271   : > { %v2010_v1 = vadd.f32 %v3228_v8, %v3208_v27  ;;  %v2001_v58 = vpop.f32.mrb[13].mxu0 }
 0x272   : > { %v2002_v43 = vadd.f32 %v2001_v58, %v1874_v17  ;;  %v3229_v5 = vpop.f32.mrb[14].mxu0 }
 0x273   : > { %v2035_v44 = vadd.f32 %v4640_v25, %v2010_v1  ;;  %v2013_v37 = vadd.f32 %v3229_v5, %v3209_v46  ;;  %v2004_v24 = vpop.f32.mrb[15].mxu0 }
 0x274   : > { %v2033_v14 = vadd.f32 %v4640_v25, %v2002_v43  ;;  %v2005_v3 = vadd.f32 %v2004_v24, %v1877_v54 }
 0x275   : > { %v2051_v50 = vmax.f32 %v2035_v44, 0.0  ;;  %v2036_v45 = vadd.f32 %v4640_v25, %v2013_v37 }
 0x276   : > { %v2049_v12 = vmax.f32 %v2033_v14, 0.0  ;;  %v2034_v38 = vadd.f32 %v4640_v25, %v2005_v3 }
 0x277   : > { %v2072_v31 = vmul.f32 %v4649_v61, %v2051_v50  ;;  %v2052_v21 = vmax.f32 %v2036_v45, 0.0 }
 0x278   : > { %v2070_v6 = vmul.f32 %v4649_v61, %v2049_v12  ;;  %v2050_v16 = vmax.f32 %v2034_v38, 0.0 }
 0x279   : > { %v2093_v19 = vadd.f32 %v4656_v39, %v2072_v31  ;;  %v2073_v10 = vmul.f32 %v4649_v61, %v2052_v21 }
 0x27a   : > { %v2091_v28 = vadd.f32 %v4656_v39, %v2070_v6  ;;  %v2071_v63 = vmul.f32 %v4649_v61, %v2050_v16 }
 0x27b   : > { %v3131_v53 = vpack.c.bf16 %v2093_v19, %v2093_v19  ;;  %v2195_v25 = vsel %vm1003_vm13, %v2093_v19, -inf  ;;  %v2094_v48 = vadd.f32 %v4656_v39, %v2073_v10 }
 0x27c   : > { %v3129_v41 = vpack.c.bf16 %v2091_v28, %v2091_v28  ;;  %v2194_v40 = vsel %vm1003_vm13, %v2091_v28, -inf  ;;  %v2092_v9 = vadd.f32 %v4656_v39, %v2071_v63 }
 0x27d   : > { %2174 = vst.msk [vmem:[%s4672_s9 + $0x38] sm:$0xf] %vm2159_vm2, %v3131_v53  ;;  %v2196_v0 = vmax.f32 %v2194_v40, %v2195_v25  ;;  %v3132_v15 = vpack.c.bf16 %v2094_v48, %v2094_v48  ;;  %v2198_v61 = vsel %vm1003_vm13, %v2094_v48, -inf }
 0x27e   : > { %2172 = vst.msk [vmem:[%s4672_s9 + $0x30] sm:$0xf] %vm2159_vm2, %v3129_v41  ;;  %v3130_v2 = vpack.c.bf16 %v2092_v9, %v2092_v9  ;;  %v2197_v13 = vsel %vm1003_vm13, %v2092_v9, -inf }
 0x27f   : > { %v2310_v39 = vcombine.high %v2196_v0, %v2196_v0  ;;  %v2317_v20 = vrot.slane %v2196_v0, %v4667_v52  ;;  %2175 = vst.msk [vmem:[%s4672_s9 + $0x3c] sm:$0xf] %vm2159_vm2, %v3132_v15  ;;  %v2199_v26 = vmax.f32 %v2197_v13, %v2198_v61 }
 0x280   : > { %2173 = vst.msk [vmem:[%s4672_s9 + $0x34] sm:$0xf] %vm2159_vm2, %v3130_v2 }
 0x281   : > { %v2324_v34 = vrot.slane %v2310_v39, %v4667_v52  ;;  %v2325_v29 = vcombine.high %v2317_v20, %v2317_v20  ;;  %v2545_v23 = vsel %vm2376_vm5, %v2317_v20, -inf  ;;  %v2327_v30 = vcombine.high %v2199_v26, %v2199_v26 }
 0x282   : > { %3345 = shalt.err (!%p3342_p3)
}
 0x283   : > { %s3346_s9 = scalar_lea.hbm %s4820_s16, 1024  ;;  %s3350_s15 = scalar_lea.hbm %s4937_s5, 4096 }
 0x284   : > { %p3347_p4 = scmp.ne.s32.totalorder %s4820_s16, %s3346_s9  ;;  %p3351_p9 = scmp.lt.u32.totalorder %s4820_s16, %s4937_s5 }
 0x285   : > { %p3352_p10 = scmp.lt.u32.totalorder %s3350_s15, %s3346_s9  ;;  %p3354_p12 = scmp.lt.u32.totalorder %s3346_s9, %s4820_s16 }
 0x286   : > { %p3348_p7 = pnand %p3347_p4, %p3517_p5 }
 0x287   : > { %p3353_p11 = por %p3352_p10, %p3351_p9 }
 0x288   : > { %p3349_p8 = pneg %p3348_p7 }
 0x289   : > { %p3355_p13 = por %p3354_p12, %p3353_p11 }
 0x28b   : > { %p3356_p0 = pnand %p3355_p13, %p3349_p8 }
 0x28d   : > { %3359 = shalt.err (!%p3356_p0)
}
 0x28e   : > { %s3442_s20 = smov 64   ;;  %v2546_v22 = vrot.slane %v2545_v23, 4  ;;  %v2334_v18 = vrot.slane %v2199_v26, %v4667_v52  ;;  %v2326_v7 = vcombine.high %v2324_v34, %v2324_v34  ;;  %v2552_v47 = vsel %vm2376_vm5, %v2325_v29, -inf  ;;  %s2814_s9 = scalar_lea.sflag [#allocation5], %s4644_s17 }
 0x28f   : > { %3249 = dma.vmem_to_hbm [thread:$0]  (%p3517_p5), %s4825_s12, 1024, %s4820_s16, %s2809_s19, %s3442_s20, %s3442_s20, %s3429_s18   ;;  %v2559_v33 = vsel %vm2376_vm5, %v2324_v34, -inf  ;;  %v2341_v62 = vrot.slane %v2327_v30, %v4667_v52  ;;  %v2553_v36 = vrot.slane %v2552_v47, 4 }
 0x290   : > { %v2547_v49 = vmax.f32 %v2545_v23, %v2546_v22  ;;  %v2560_v56 = vrot.slane %v2559_v33, 4  ;;  %v2342_v51 = vcombine.high %v2334_v18, %v2334_v18  ;;  %v2566_v4 = vsel %vm2376_vm5, %v2326_v7, -inf  ;;  %s3166_s12 = sshll.u32 %s3500_s25, 8  ;;  %s2843_s16 = sshll.u32 %s4704_s14, 4  ;;  %s4884_s16 = int_to_ptr.vmem [resolvable:$true] %s2843_s16 }
 0x291   : > { %v2343_v35 = vcombine.high %v2341_v62, %v2341_v62  ;;  %v2573_v55 = vsel %vm2376_vm5, %v2334_v18, -inf  ;;  %v2587_v60 = vsel %vm2376_vm5, %v2341_v62, -inf  ;;  %v2554_v32 = vmax.f32 %v2552_v47, %v2553_v36  ;;  %s4882_s29 = scalar_lea.hbm %s4938_s6, %s3166_s12  ;;  %s3360_s25 = scalar_lea.vmem %s4884_s16, 256 }
 0x292   : > { %v2548_v59 = vrot.slane %v2547_v49, 2  ;;  %v2561_v42 = vmax.f32 %v2559_v33, %v2560_v56  ;;  %v2567_v11 = vrot.slane %v2566_v4, 4  ;;  %v2574_v57 = vrot.slane %v2573_v55, 4  ;;  %p3361_p1 = scmp.ne.s32.totalorder %s4884_s16, %s3360_s25  ;;  %s3443_s10 = smov [#allocation4]  }
 0x293   : > { %v2580_v27 = vsel %vm2376_vm5, %v2342_v51, -inf  ;;  %v2588_v17 = vrot.slane %v2587_v60, 4  ;;  %v2594_v52 = vsel %vm2376_vm5, %v2343_v35, -inf  ;;  %v2555_v54 = vrot.slane %v2554_v32, 2  ;;  %s3364_s11 = sshll.u32 %s3443_s10, 4  ;;  %s3365_s11 = int_to_ptr.vmem [resolvable:$false] %s3364_s11 }
 0x294   : > { %v2549_v46 = vmax.f32 %v2547_v49, %v2548_v59  ;;  %v2562_v8 = vrot.slane %v2561_v42, 2  ;;  %v2568_v1 = vmax.f32 %v2566_v4, %v2567_v11  ;;  %v2575_v58 = vmax.f32 %v2573_v55, %v2574_v57  ;;  %p3362_p2 = pnand %p3361_p1, %p3517_p5  ;;  %s3366_s15 = scalar_lea.vmem %s3365_s11, 512 }
 0x295   : > { %v2581_v43 = vrot.slane %v2580_v27, 4  ;;  %v2589_v5 = vmax.f32 %v2587_v60, %v2588_v17  ;;  %v2595_v44 = vrot.slane %v2594_v52, 4  ;;  %v2556_v24 = vmax.f32 %v2554_v32, %v2555_v54  ;;  %p3367_p4 = scmp.lt.s32.totalorder %s4884_s16, %s3365_s11  ;;  %p3368_p7 = scmp.lt.s32.totalorder %s3366_s15, %s3360_s25 }
 0x296   : > { %v2550_v37 = vrot.slane %v2549_v46, 1  ;;  %v2563_v14 = vmax.f32 %v2561_v42, %v2562_v8  ;;  %v2569_v3 = vrot.slane %v2568_v1, 2  ;;  %v2576_v50 = vrot.slane %v2575_v58, 2  ;;  %p3363_p3 = pneg %p3362_p2 }
 0x297   : > { %v2582_v45 = vmax.f32 %v2580_v27, %v2581_v43  ;;  %v2590_v12 = vrot.slane %v2589_v5, 2  ;;  %v2596_v38 = vmax.f32 %v2594_v52, %v2595_v44  ;;  %v2557_v21 = vrot.slane %v2556_v24, 1  ;;  %p3369_p8 = por %p3368_p7, %p3367_p4 }
 0x298   : > { %v2551_v31 = vmax.f32 %v2549_v46, %v2550_v37  ;;  %v2564_v6 = vrot.slane %v2563_v14, 1  ;;  %v2570_v16 = vmax.f32 %v2568_v1, %v2569_v3  ;;  %v2577_v19 = vmax.f32 %v2575_v58, %v2576_v50 }
 0x299   : > { %v2583_v10 = vrot.slane %v2582_v45, 2  ;;  %v2591_v28 = vmax.f32 %v2589_v5, %v2590_v12  ;;  %v2597_v63 = vrot.slane %v2596_v38, 2  ;;  %v2558_v53 = vmax.f32 %v2556_v24, %v2557_v21  ;;  %p3370_p9 = pnand %p3369_p8, %p3363_p3 }
 0x29a   : > { %v2565_v25 = vmax.f32 %v2563_v14, %v2564_v6  ;;  %v2571_v48 = vrot.slane %v2570_v16, 1  ;;  %v3157_v41 = vpack.c.bf16 %v2551_v31, %v2551_v31  ;;  %v2578_v40 = vrot.slane %v2577_v19, 1 }
 0x29b   : > { %v2584_v9 = vmax.f32 %v2582_v45, %v2583_v10  ;;  %v2592_v0 = vrot.slane %v2591_v28, 1  ;;  %v2598_v15 = vmax.f32 %v2596_v38, %v2597_v63  ;;  %v3158_v2 = vpack.c.bf16 %v2558_v53, %v2558_v53 }
 0x29c   : > { %v2572_v61 = vmax.f32 %v2570_v16, %v2571_v48  ;;  %v3159_v13 = vpack.c.bf16 %v2565_v25, %v2565_v25  ;;  %v2579_v39 = vmax.f32 %v2577_v19, %v2578_v40  ;;  %v2753_v23 = vunpack.c.l.b16 %v3157_v41 }
 0x29d   : > { %v2585_v20 = vrot.slane %v2584_v9, 1  ;;  %v2593_v26 = vmax.f32 %v2591_v28, %v2592_v0  ;;  %v2599_v34 = vrot.slane %v2598_v15, 1  ;;  %v2754_v30 = vunpack.c.l.b16 %v3158_v2 }
 0x29e   : > { %v3160_v29 = vpack.c.bf16 %v2572_v61, %v2572_v61  ;;  %v2755_v22 = vunpack.c.l.b16 %v3159_v13  ;;  %v3161_v47 = vpack.c.bf16 %v2579_v39, %v2579_v39 }
 0x29f   : > { %v2586_v18 = vmax.f32 %v2584_v9, %v2585_v20  ;;  %v2600_v7 = vmax.f32 %v2598_v15, %v2599_v34  ;;  %v2789_v62 = vsel %vm2761_vm8, %v2754_v30, %v2753_v23  ;;  %v3163_v49 = vpack.c.bf16 %v2593_v26, %v2593_v26 }
 0x2a0   : > { %v2756_v33 = vunpack.c.l.b16 %v3160_v29  ;;  %v2790_v36 = vsel %vm2763_vm9, %v2755_v22, %v2789_v62  ;;  %v2757_v4 = vunpack.c.l.b16 %v3161_v47 }
 0x2a1   : > { %v3162_v56 = vpack.c.bf16 %v2586_v18, %v2586_v18  ;;  %v3164_v51 = vpack.c.bf16 %v2600_v7, %v2600_v7  ;;  %v2759_v59 = vunpack.c.l.b16 %v3163_v49 }
 0x2a2   : > { %v2791_v35 = vsel %vm2765_vm10, %v2756_v33, %v2790_v36 }
 0x2a3   : > { %v2758_v55 = vunpack.c.l.b16 %v3162_v56  ;;  %v2792_v60 = vsel %vm2767_vm11, %v2757_v4, %v2791_v35  ;;  %v2760_v32 = vunpack.c.l.b16 %v3164_v51 }
 0x2a5   : > { %v2793_v42 = vsel %vm2769_vm12, %v2758_v55, %v2792_v60 }
 0x2a6   : > { %v2794_v11 = vsel %vm2771_vm14, %v2759_v59, %v2793_v42 }
 0x2a7   : > { %v2795_v57 = vsel %vm2773_vm15, %v2760_v32, %v2794_v11 }
 0x2a8   : > { %v2799_v27 = vpack.c.b16 %v2795_v57, %v2795_v57 }
 0x2aa   : > { %2807 = vst.msk [vmem:[%s4704_s14 + $0xc] sm:$0xf] %vm2159_vm2, %v2799_v27 }
 0x2ab   : > { %3373 = shalt.err (!%p3370_p9)
}
 0x2ac   : > { %s3374_s14 = scalar_lea.hbm %s4882_s29, 256  ;;  %s3378_s12 = scalar_lea.hbm %s4938_s6, 1024 }
 0x2ad   : > { %p3375_p10 = scmp.ne.s32.totalorder %s4882_s29, %s3374_s14  ;;  %p3379_p13 = scmp.lt.u32.totalorder %s4882_s29, %s4938_s6 }
 0x2ae   : > { %p3380_p0 = scmp.lt.u32.totalorder %s3378_s12, %s3374_s14  ;;  %p3382_p2 = scmp.lt.u32.totalorder %s3374_s14, %s4882_s29 }
 0x2af   : > { %p3376_p11 = pnand %p3375_p10, %p3517_p5 }
 0x2b0   : > { %p3381_p1 = por %p3380_p0, %p3379_p13 }
 0x2b1   : > { %p3377_p12 = pneg %p3376_p11 }
 0x2b2   : > { %p3383_p3 = por %p3382_p2, %p3381_p1 }
 0x2b4   : > { %p3384_p4 = pnand %p3383_p3, %p3377_p12 }
 0x2b6   : > { %3387 = shalt.err (!%p3384_p4)
}
 0x2b7   : > { %3250 = dma.vmem_to_hbm [thread:$0]  (%p3517_p5), %s4884_s16, 256, %s4882_s29, %s2814_s9, %s3442_s20, %s3442_s20, %s3429_s18  }
 0x2b8 PF: > { %p3260_p7 = scmp.ge.s32.totalorder %s3426_s24, 2  ;;  %s2858_s25 = sand.u32 1, %s3414_s21  }
 0x2b9   : > { %s2859_s10 = scalar_lea.sflag [#allocation3], %s2858_s25 }
 0x2ba   : > { %p3254_p8 = pnand %p3260_p7, %p3521_p6 }
 0x2bc   : > { %3405 = dma.done.wait (!%p3254_p8), %s2859_s10, 1024  }
 0x2bd   : > { %3407 = vsyncadd (!%p3254_p8), %s2859_s10, 4294966272  ;;  %s2868_s7 = scalar_lea.sflag [#allocation5], %s2858_s25 }
 0x2be   : > { %3409 = dma.done.wait (!%p3254_p8), %s2868_s7, 256  }
 0x2bf   : > { %3411 = vsyncadd (!%p3254_p8), %s2868_s7, 4294967040  ;;  %p20_p5 = scmp.ge.s32.totalorder %s3504_s27, 6   ;;  %s4951_s21 = smov %s3418_s22 }
 0x2c0   : > { %s4952_s22 = smov %s3422_s23  ;;  %s4953_s23 = smov %s3515_s30 }
 0x2c1   : > { %s4954_s24 = smov %s3504_s27  ;;  %22 = sbr.rel (!%p20_p5) target bundleno = 5 (0x5), region = 95 }
 0x2c8   :  { %2873 = vsyncpa [#allocation3], 1 }
 0x2c9   :  { %2875 = vsyncpa [#allocation3 + $0x1], 1 }
 0x2ca   :  { %2876 = vsyncpa [#allocation5], 1 }
 0x2cb   :  { %2878 = vsyncpa [#allocation5 + $0x1], 1 }

</bundles_post_ra>
